<compile_context>
chip_gen: v6e
topology: v6e:2x2x1
jax: 0.10.0
libtpu: 0.0.40
codegen_flags: <defaults>
</compile_context>

<pallas_src>
import math
import functools

import jax
import jax.numpy as jnp
from jax import lax
from jax.experimental import pallas as pl
from jax.experimental.pallas import tpu as pltpu

# Activation storage / MXU input dtype.  bf16 halves HBM traffic of every stage and
# runs the MXU at its native rate on v5e/v6e/v7x; accumulation stays fp32.
ACT_DTYPE = jnp.bfloat16
ROW_ALIGN = 16 if ACT_DTYPE == jnp.bfloat16 else 8


def _pick_tile(dim, target, align):
    """Largest tile <= target that divides dim and is a multiple of align, else dim."""
    if dim <= target:
        return dim
    t = (target // align) * align
    while t >= align:
        if dim % t == 0:
            return t
        t -= align
    return dim


def _pick_q_tile(m, span, target, align):
    """Query tile: prefer a divisor of m that also divides span (-> no kv padding)."""
    if m <= target:
        return m
    t = (target // align) * align
    fallback = None
    while t >= align:
        if m % t == 0:
            if fallback is None:
                fallback = t
            if span % t == 0:
                return t
        t -= align
    return fallback if fallback is not None else m


# ----------------------------------------------------------------------------
# Tiled linear:  y = act(x @ w_t + bias)          (bf16 in / bf16 out / fp32 acc)
# ----------------------------------------------------------------------------
def _matmul_kernel(x_ref, w_ref, b_ref, o_ref, acc_ref, *, activation):
    @pl.when(pl.program_id(2) == 0)
    def _init():
        acc_ref[...] = jnp.zeros_like(acc_ref)

    acc_ref[...] += jnp.dot(x_ref[...], w_ref[...],
                            preferred_element_type=jnp.float32)

    @pl.when(pl.program_id(2) == pl.num_programs(2) - 1)
    def _finalize():
        r = acc_ref[...] + b_ref[...]
        if activation == "relu":
            r = jnp.maximum(r, 0.0)
        o_ref[...] = r.astype(o_ref.dtype)


def pallas_linear(x, w_t, bias=None, activation=None, out_dtype=None):
    """x: (N, Kin), w_t: (Kin, Nout) (pre-transposed nn.Linear weight)."""
    n, kin = x.shape
    nout = w_t.shape[1]
    if out_dtype is None:
        out_dtype = ACT_DTYPE
    if bias is None:
        bias = jnp.zeros((nout,), jnp.float32)
    tm = _pick_tile(n, 512, ROW_ALIGN)
    tn = _pick_tile(nout, 256, 128)
    tk = _pick_tile(kin, 512, 128)
    grid = (n // tm, nout // tn, kin // tk)
    kern = functools.partial(_matmul_kernel, activation=activation)
    # bias index map is k-invariant -> DMA'd once per (i, j) output tile, not per k.
    return pl.pallas_call(
        kern,
        out_shape=jax.ShapeDtypeStruct((n, nout), out_dtype),
        grid=grid,
        in_specs=[
            pl.BlockSpec((tm, tk), lambda i, j, k: (i, k)),
            pl.BlockSpec((tk, tn), lambda i, j, k: (k, j)),
            pl.BlockSpec((1, tn), lambda i, j, k: (0, j)),
        ],
        out_specs=pl.BlockSpec((tm, tn), lambda i, j, k: (i, j)),
        scratch_shapes=[pltpu.VMEM((tm, tn), jnp.float32)],
        compiler_params=pltpu.CompilerParams(
            dimension_semantics=("parallel", "parallel", "arbitrary")),
    )(x, w_t, bias.reshape(1, nout).astype(jnp.float32))


# ----------------------------------------------------------------------------
# Fused linear + residual + LayerNorm:  y = LN(residual + x @ w_t + bias)
# ----------------------------------------------------------------------------
def _matmul_res_ln_kernel(x_ref, w_ref, b_ref, res_ref, g_ref, beta_ref,
                          o_ref, acc_ref, *, eps):
    @pl.when(pl.program_id(1) == 0)
    def _init():
        acc_ref[...] = jnp.zeros_like(acc_ref)

    acc_ref[...] += jnp.dot(x_ref[...], w_ref[...],
                            preferred_element_type=jnp.float32)

    @pl.when(pl.program_id(1) == pl.num_programs(1) - 1)
    def _finalize():
        s = acc_ref[...] + b_ref[...] + res_ref[...].astype(jnp.float32)
        mu = jnp.mean(s, axis=-1, keepdims=True)
        d = s - mu
        var = jnp.mean(d * d, axis=-1, keepdims=True)
        o_ref[...] = ((d * lax.rsqrt(var + eps)) * g_ref[...]
                      + beta_ref[...]).astype(o_ref.dtype)


def pallas_linear_residual_ln(x, w_t, bias, residual, gamma, beta, *,
                              eps=1e-5, out_dtype=None):
    """LN(residual + x @ w_t + bias); output width = full feature dim."""
    n, kin = x.shape
    h = w_t.shape[1]
    if out_dtype is None:
        out_dtype = ACT_DTYPE
    tm = _pick_tile(n, 256, ROW_ALIGN)
    tk = _pick_tile(kin, 512, 128)
    grid = (n // tm, kin // tk)
    return pl.pallas_call(
        functools.partial(_matmul_res_ln_kernel, eps=eps),
        out_shape=jax.ShapeDtypeStruct((n, h), out_dtype),
        grid=grid,
        in_specs=[
            pl.BlockSpec((tm, tk), lambda i, k: (i, k)),
            pl.BlockSpec((tk, h), lambda i, k: (k, 0)),
            pl.BlockSpec((1, h), lambda i, k: (0, 0)),
            pl.BlockSpec((tm, h), lambda i, k: (i, 0)),   # residual: k-invariant
            pl.BlockSpec((1, h), lambda i, k: (0, 0)),
            pl.BlockSpec((1, h), lambda i, k: (0, 0)),
        ],
        out_specs=pl.BlockSpec((tm, h), lambda i, k: (i, 0)),
        scratch_shapes=[pltpu.VMEM((tm, h), jnp.float32)],
        compiler_params=pltpu.CompilerParams(
            dimension_semantics=("parallel", "arbitrary")),
    )(x, w_t, bias.reshape(1, h).astype(jnp.float32), residual,
      gamma.reshape(1, h).astype(jnp.float32),
      beta.reshape(1, h).astype(jnp.float32))


# ----------------------------------------------------------------------------
# Banded (adaptive-span) multi-head attention, fused with wo + residual + LayerNorm
# ----------------------------------------------------------------------------
def _attn_kernel(q_ref, *refs, num_heads, head_dim, span, nkv, eps):
    kv_refs = refs[:nkv]
    pos_ref, wo_ref, res_ref, g_ref, b_ref, o_ref = refs[nkv:]

    q_all = q_ref[0]                                              # (tq, H), pre-scaled
    kv_win = jnp.concatenate([r[0] for r in kv_refs], axis=0)     # (W, 2H) key || value
    pos = pos_ref[...]                                            # (D, span)
    tq = q_all.shape[0]
    W = kv_win.shape[0]
    H = num_heads * head_dim

    # Band mask and skew select masks: computed ONCE per grid step and shared by every
    # head (JAX does not CSE broadcast_in_dim, so hoisting matters).
    row = lax.broadcasted_iota(jnp.int32, (tq, W), 0)
    col = lax.broadcasted_iota(jnp.int32, (tq, W), 1)
    rel = col - row
    band = (rel >= 0) & (rel < span)
    neg_big = jnp.float32(-1e30)
    row_bits = lax.broadcasted_iota(jnp.int32, (tq, 1), 0)
    shift_masks = []
    shift = 1
    while shift < tq:
        shift_masks.append(
            (shift, jnp.broadcast_to((row_bits & shift) != 0, (tq, W))))
        shift *= 2

    outs = []
    for h in range(num_heads):
        lo, hi = h * head_dim, (h + 1) * head_dim
        q_h = q_all[:, lo:hi]                                     # (tq, D)
        k_h = kv_win[:, lo:hi]                                    # (W, D)
        v_h = kv_win[:, H + lo:H + hi]                            # (W, D)

        # Context scores on the MXU: (tq, W), fp32 accumulation from bf16 inputs.
        s = lax.dot_general(q_h, k_h, (((1,), (1,)), ((), ())),
                            preferred_element_type=jnp.float32)
        # Relative-position scores on the MXU: (tq, span)
        p = jnp.dot(q_h, pos, preferred_element_type=jnp.float32)

        # "Skew": place p[t, r] at window column t + r via O(log tq) shift+selects.
        # Kept as exact slice-rotates (pltpu.roll's lowering for narrow, non-128-lane
        # windows is not guaranteed); misplaced / wrapped lanes are masked below.
        if W > span:
            p = jnp.concatenate([p, jnp.zeros((tq, W - span), jnp.float32)], axis=1)
        for sh, msk in shift_masks:
            rolled = jnp.concatenate([p[:, W - sh:], p[:, :W - sh]], axis=1)
            p = jnp.where(msk, rolled, p)

        s = jnp.where(band, s + p, neg_big)

        # Band softmax in fp32. exp(-1e30 - m) underflows to exactly 0, so no second
        # masking pass; only the (tq, 1) denominator hits the EUP reciprocal.
        m = jnp.max(s, axis=-1, keepdims=True)
        e = jnp.exp(s - m)
        denom = jnp.sum(e, axis=-1, keepdims=True)
        attn = (e * pl.reciprocal(denom, approx=True)).astype(v_h.dtype)

        outs.append(jnp.dot(attn, v_h, preferred_element_type=jnp.float32))

    # Fused epilogue: out-projection (wo resident in VMEM), residual add, LayerNorm.
    attn_out = jnp.concatenate(outs, axis=1)                      # (tq, H) fp32
    proj = jnp.dot(attn_out.astype(wo_ref.dtype), wo_ref[...],
                   preferred_element_type=jnp.float32)
    s = proj + res_ref[0].astype(jnp.float32)
    mu = jnp.mean(s, axis=-1, keepdims=True)
    d = s - mu
    var = jnp.mean(d * d, axis=-1, keepdims=True)
    o_ref[0] = ((d * lax.rsqrt(var + eps)) * g_ref[...] + b_ref[...]).astype(o_ref.dtype)


def attention_block(q, kv, pos_encoding, wo_t, residual, gamma, beta, *,
                    num_heads, eps=1e-5, q_tile=None):
    """h1 = LayerNorm(residual + BandedAttention(q, kv) @ wo_t).

    q:  (B, M, H)   projected queries (1/sqrt(H) folded into the projection weight)
    kv: (B, L, 2H)  projected keys (cols [0,H)) and values (cols [H,2H)), L = M + span
    pos_encoding: (D, span); wo_t: (H, H); residual: (B, M, H)
    """
    B, M, H = q.shape
    D = H // num_heads
    span = pos_encoding.shape[1]
    L = kv.shape[1]
    assert kv.shape[2] == 2 * H
    assert L == M + span, "key/value length must be query length + attn_span"

    tq = q_tile or _pick_q_tile(M, span, 256, ROW_ALIGN)
    nq = M // tq
    nkv = 1 + pl.cdiv(span, tq)          # tq-sized key blocks covering the window
    Lp = (nq - 1 + nkv) * tq
    if Lp != L:
        # Only when span % tq != 0: padded rows are always out-of-band (masked).
        kv = jnp.pad(kv, ((0, 0), (0, Lp - L), (0, 0)))

    kern = functools.partial(_attn_kernel, num_heads=num_heads, head_dim=D,
                             span=span, nkv=nkv, eps=eps)
    kv_specs = [pl.BlockSpec((1, tq, 2 * H), (lambda b, i, j=j: (b, i + j, 0)))
                for j in range(nkv)]

    return pl.pallas_call(
        kern,
        out_shape=jax.ShapeDtypeStruct((B, M, H), ACT_DTYPE),
        grid=(B, nq),
        in_specs=([pl.BlockSpec((1, tq, H), lambda b, i: (b, i, 0))]
                  + kv_specs
                  + [pl.BlockSpec((D, span), lambda b, i: (0, 0)),
                     pl.BlockSpec((H, H), lambda b, i: (0, 0)),      # wo: grid-invariant
                     pl.BlockSpec((1, tq, H), lambda b, i: (b, i, 0)),
                     pl.BlockSpec((1, H), lambda b, i: (0, 0)),
                     pl.BlockSpec((1, H), lambda b, i: (0, 0))]),
        out_specs=pl.BlockSpec((1, tq, H), lambda b, i: (b, i, 0)),
        compiler_params=pltpu.CompilerParams(
            dimension_semantics=("parallel", "parallel")),
    )(q, *([kv] * nkv), pos_encoding, wo_t, residual,
      gamma.reshape(1, H).astype(jnp.float32),
      beta.reshape(1, H).astype(jnp.float32))


# ----------------------------------------------------------------------------
# TransformerSeqLayer forward (attention + norm1, feed-forward + norm3)
# ----------------------------------------------------------------------------
def transformer_seq_layer_forward(h, h_cache, pos_encoding, params, *, num_heads):
    B, M, H = h.shape
    assert H % num_heads == 0
    h_act = h.astype(ACT_DTYPE)
    cache_act = h_cache.astype(ACT_DTYPE)
    h_all = jnp.concatenate([cache_act, h_act], axis=1)         # (B, L, H), L = M + span
    L = h_all.shape[1]

    # ---- MultiHeadSeqAttention --------------------------------------------------
    # 1/sqrt(hidden_size) folded into the query projection weight: it scales both the
    # context and the relative-position scores, exactly as in the reference.
    wq_t = (params["wq"].T * (1.0 / math.sqrt(H))).astype(ACT_DTYPE)         # (H, H)
    wkv_t = jnp.concatenate([params["wk"].T, params["wv"].T],
                            axis=1).astype(ACT_DTYPE)                        # (H, 2H)
    wo_t = params["wo"].T.astype(ACT_DTYPE)

    q = pallas_linear(h_act.reshape(B * M, H), wq_t).reshape(B, M, H)
    kv = pallas_linear(h_all.reshape(B * L, H), wkv_t).reshape(B, L, 2 * H)

    # Attention + out-projection + residual + LayerNorm(norm1), fused in one kernel.
    h1 = attention_block(q, kv, pos_encoding.astype(ACT_DTYPE), wo_t, h_act,
                         params["ln1_g"], params["ln1_b"], num_heads=num_heads)

    # TODO(synk): SMoE branch (MomentumLayer/AdamLayer/AdEMAMixLayer over
    # FMoETransformerMLP) needs the external fastmoe gate/experts and is not translated;
    # this layer instance is configured without it (g not in {'m','a','e'}).

    # ---- FeedForwardLayer + norm3 (w2 projection fused with residual + LayerNorm) --
    h1_flat = h1.reshape(B * M, H)
    ff = pallas_linear(h1_flat, params["w1"].T.astype(ACT_DTYPE),
                       bias=params["b1"], activation="relu")
    h2 = pallas_linear_residual_ln(ff, params["w2"].T.astype(ACT_DTYPE),
                                   params["b2"], h1_flat,
                                   params["ln3_g"], params["ln3_b"],
                                   out_dtype=jnp.float32)
    return h2.reshape(B, M, H)


# ----------------------------------------------------------------------------
# Pure-JAX reference mirroring the PyTorch module (for verification)
# ----------------------------------------------------------------------------
_HI = jax.lax.Precision.HIGHEST


def _mm(a, b):
    return jnp.matmul(a, b, precision=_HI)


def _skew_ref(X, pad_value):
    B, M, L = X.shape
    X = jnp.pad(X, ((0, 0), (0, 0), (0, M + 1)), constant_values=pad_value)
    X = X.reshape(B, -1)[:, :-M]
    return X.reshape(B, M, M + L)


def _unskew_ref(X):
    B, M, L = X.shape
    Ls = L - M
    X = X.reshape(B, -1)
    X = jnp.pad(X, ((0, 0), (0, M)))
    X = X.reshape(B, M, M + Ls + 1)
    return X[:, :, :Ls]


def _head_split_ref(x, K):
    B, M, H = x.shape
    D = H // K
    x = x.reshape(B, M, K, D)
    return jnp.transpose(x, (0, 2, 1, 3)).reshape(B * K, M, D)


def _layernorm_ref(x, g, b, eps=1e-5):
    mu = jnp.mean(x, axis=-1, keepdims=True)
    var = jnp.mean((x - mu) ** 2, axis=-1, keepdims=True)
    return (x - mu) / jnp.sqrt(var + eps) * g + b


def reference_forward(h, h_cache, pos_encoding, params, *, num_heads):
    B, M, H = h.shape
    D = H // num_heads
    h_all = jnp.concatenate([h_cache, h], axis=1)
    q = _head_split_ref(_mm(h, params["wq"].T), num_heads)
    k = _head_split_ref(_mm(h_all, params["wk"].T), num_heads)
    v = _head_split_ref(_mm(h_all, params["wv"].T), num_heads)
    attn_ctx = _unskew_ref(_mm(q, jnp.swapaxes(k, -1, -2)))
    attn = (attn_ctx + _mm(q, pos_encoding)) / math.sqrt(H)
    attn = jax.nn.softmax(attn, axis=-1)
    out = _mm(_skew_ref(attn, 0.0), v)
    out = jnp.transpose(out.reshape(B, num_heads, M, D), (0, 2, 1, 3)).reshape(B, M, H)
    out = _mm(out, params["wo"].T)
    h1 = _layernorm_ref(h + out, params["ln1_g"], params["ln1_b"])
    ff = _mm(jnp.maximum(_mm(h1, params["w1"].T) + params["b1"], 0.0),
             params["w2"].T) + params["b2"]
    return _layernorm_ref(h1 + ff, params["ln3_g"], params["ln3_b"])


# ----------------------------------------------------------------------------
if __name__ == "__main__":
    B, M, H, NUM_HEADS, SPAN, INNER = 2, 16, 32, 4, 16, 64
    D = H // NUM_HEADS

    root = jax.random.PRNGKey(0)
    ks = jax.random.split(root, 16)
    h = jax.random.normal(ks[0], (B, M, H), jnp.float32)
    h_cache = jax.random.normal(ks[1], (B, SPAN, H), jnp.float32)   # cache len == attn_span
    pos_enc = 0.1 * jax.random.normal(ks[2], (D, SPAN), jnp.float32)

    def _lin(key, out_dim, in_dim):                 # PyTorch nn.Linear default init
        bound = 1.0 / math.sqrt(in_dim)
        return jax.random.uniform(key, (out_dim, in_dim), jnp.float32, -bound, bound)

    params = {
        "wq": _lin(ks[3], H, H),
        "wk": _lin(ks[4], H, H),
        "wv": _lin(ks[5], H, H),
        "wo": _lin(ks[6], H, H),
        "w1": _lin(ks[7], INNER, H),
        "b1": 0.1 * jax.random.normal(ks[8], (INNER,), jnp.float32),
        "w2": _lin(ks[9], H, INNER),
        "b2": 0.1 * jax.random.normal(ks[10], (H,), jnp.float32),
        "ln1_g": 1.0 + 0.1 * jax.random.normal(ks[11], (H,), jnp.float32),
        "ln1_b": 0.1 * jax.random.normal(ks[12], (H,), jnp.float32),
        "ln3_g": 1.0 + 0.1 * jax.random.normal(ks[13], (H,), jnp.float32),
        "ln3_b": 0.1 * jax.random.normal(ks[14], (H,), jnp.float32),
    }

    fwd = jax.jit(functools.partial(transformer_seq_layer_forward, num_heads=NUM_HEADS))
    out = jax.block_until_ready(fwd(h, h_cache, pos_enc, params))

    ref = reference_forward(h, h_cache, pos_enc, params, num_heads=NUM_HEADS)
    assert out.shape == (B, M, H), out.shape
    assert bool(jnp.all(jnp.isfinite(out)))
    # Tolerance covers bf16 activation storage + bf16 MXU inputs + approx softmax
    # reciprocal vs. the fp32 HIGHEST-precision pure-JAX reference; any structural or
    # indexing bug would be O(1) off.
    max_diff = float(jnp.max(jnp.abs(out - ref)))
    assert jnp.allclose(out, ref, rtol=5e-2, atol=5e-2), f"max abs diff = {max_diff}"
    print("KERNEL_OK")
</pallas_src>

<mosaic_0001>
module attributes {stable_mosaic.version = 11 : i64} {
  func.func @_matmul_kernel(%arg0: i32, %arg1: i32, %arg2: i32, %arg3: memref<64x32xbf16, #tpu.memory_space<vmem>>, %arg4: memref<32x64xbf16, #tpu.memory_space<vmem>>, %arg5: memref<1x64xf32, #tpu.memory_space<vmem>>, %arg6: memref<64x64xbf16, #tpu.memory_space<vmem>>, %arg7: memref<64x64xf32, #tpu.memory_space<vmem>>) attributes {dimension_semantics = [#tpu.dimension_semantics<parallel>, #tpu.dimension_semantics<parallel>, #tpu.dimension_semantics<arbitrary>], iteration_bounds = array<i64: 1, 1, 1>, scalar_prefetch = 0 : i64, scratch_operands = 1 : i64, tpu.core_type = #tpu.core_type<tc>, window_params = [{transform_indices = @transform_0, window_bounds = array<i64: 64, 32>}, {transform_indices = @transform_1, window_bounds = array<i64: 32, 64>}, {transform_indices = @transform_2, window_bounds = array<i64: 1, 64>}, {transform_indices = @transform_3, window_bounds = array<i64: 64, 64>}]} {
    %c0_i32 = arith.constant 0 : i32
    %0 = arith.cmpi eq, %arg2, %c0_i32 : i32
    %1 = arith.extui %0 : i1 to i32
    %c0_i32_0 = arith.constant 0 : i32
    %2 = arith.cmpi ne, %1, %c0_i32_0 : i32
    scf.if %2 {
      %cst_10 = arith.constant 0.000000e+00 : f32
      %12 = vector.broadcast %cst_10 : f32 to vector<64x64xf32>
      %c0_11 = arith.constant 0 : index
      %c0_12 = arith.constant 0 : index
      %13 = vector.load %arg7[%c0_11, %c0_12] : memref<64x64xf32, #tpu.memory_space<vmem>>, vector<64x64xf32>
      tpu.vector_store %arg7[%c0_11, %c0_12], %12 {strides = array<i32>} : memref<64x64xf32, #tpu.memory_space<vmem>>, vector<64x64xf32>,
    } else {
    }
    %c0 = arith.constant 0 : index
    %c0_1 = arith.constant 0 : index
    %3 = vector.load %arg7[%c0, %c0_1] : memref<64x64xf32, #tpu.memory_space<vmem>>, vector<64x64xf32>
    %c0_2 = arith.constant 0 : index
    %c0_3 = arith.constant 0 : index
    %4 = vector.load %arg3[%c0_2, %c0_3] : memref<64x32xbf16, #tpu.memory_space<vmem>>, vector<64x32xbf16>
    %c0_4 = arith.constant 0 : index
    %c0_5 = arith.constant 0 : index
    %5 = vector.load %arg4[%c0_4, %c0_5] : memref<32x64xbf16, #tpu.memory_space<vmem>>, vector<32x64xbf16>
    %cst = arith.constant dense<0.000000e+00> : vector<64x64xf32>
    %6 = tpu.matmul %4, %5, %cst {dimension_numbers = #tpu.dot_dimension_numbers<[1], [0], [0], [1], [0, 0, 1, 1], [], []>} : vector<64x32xbf16>, vector<32x64xbf16>, vector<64x64xf32> -> vector<64x64xf32>
    %7 = arith.addf %3, %6 : vector<64x64xf32>
    %c0_6 = arith.constant 0 : index
    %c0_7 = arith.constant 0 : index
    %8 = vector.load %arg7[%c0_6, %c0_7] : memref<64x64xf32, #tpu.memory_space<vmem>>, vector<64x64xf32>
    tpu.vector_store %arg7[%c0_6, %c0_7], %7 {strides = array<i32>} : memref<64x64xf32, #tpu.memory_space<vmem>>, vector<64x64xf32>,
    %c0_i32_8 = arith.constant 0 : i32
    %9 = arith.cmpi eq, %arg2, %c0_i32_8 : i32
    %10 = arith.extui %9 : i1 to i32
    %c0_i32_9 = arith.constant 0 : i32
    %11 = arith.cmpi ne, %10, %c0_i32_9 : i32
    scf.if %11 {
      %c0_10 = arith.constant 0 : index
      %c0_11 = arith.constant 0 : index
      %12 = vector.load %arg7[%c0_10, %c0_11] : memref<64x64xf32, #tpu.memory_space<vmem>>, vector<64x64xf32>
      %c0_12 = arith.constant 0 : index
      %c0_13 = arith.constant 0 : index
      %13 = vector.load %arg5[%c0_12, %c0_13] : memref<1x64xf32, #tpu.memory_space<vmem>>, vector<1x64xf32>
      %14 = vector.broadcast %13 : vector<1x64xf32> to vector<64x64xf32>
      %15 = arith.addf %12, %14 : vector<64x64xf32>
      %16 = arith.truncf %15 : vector<64x64xf32> to vector<64x64xbf16>
      %c0_14 = arith.constant 0 : index
      %c0_15 = arith.constant 0 : index
      %17 = vector.load %arg6[%c0_14, %c0_15] : memref<64x64xbf16, #tpu.memory_space<vmem>>, vector<64x64xbf16>
      tpu.vector_store %arg6[%c0_14, %c0_15], %16 {strides = array<i32>} : memref<64x64xbf16, #tpu.memory_space<vmem>>, vector<64x64xbf16>,
    } else {
    }
    return
  }
  func.func @transform_0(%arg0: i32, %arg1: i32, %arg2: i32) -> (i32, i32) {
    %c0_i32 = arith.constant 0 : i32
    return %arg0, %arg2 : i32, i32
  }
  func.func @transform_1(%arg0: i32, %arg1: i32, %arg2: i32) -> (i32, i32) {
    %c0_i32 = arith.constant 0 : i32
    return %arg2, %arg1 : i32, i32
  }
  func.func @transform_2(%arg0: i32, %arg1: i32, %arg2: i32) -> (i32, i32) {
    %c0_i32 = arith.constant 0 : i32
    %c0_i32_0 = arith.constant 0 : i32
    return %c0_i32, %arg1 : i32, i32
  }
  func.func @transform_3(%arg0: i32, %arg1: i32, %arg2: i32) -> (i32, i32) {
    %c0_i32 = arith.constant 0 : i32
    return %arg0, %arg1 : i32, i32
  }
}

module attributes {stable_mosaic.version = 11 : i64} {
  func.func @_matmul_kernel(%arg0: i32, %arg1: i32, %arg2: i32, %arg3: memref<32x32xbf16, #tpu.memory_space<vmem>>, %arg4: memref<32x32xbf16, #tpu.memory_space<vmem>>, %arg5: memref<1x32xf32, #tpu.memory_space<vmem>>, %arg6: memref<32x32xbf16, #tpu.memory_space<vmem>>, %arg7: memref<32x32xf32, #tpu.memory_space<vmem>>) attributes {dimension_semantics = [#tpu.dimension_semantics<parallel>, #tpu.dimension_semantics<parallel>, #tpu.dimension_semantics<arbitrary>], iteration_bounds = array<i64: 1, 1, 1>, scalar_prefetch = 0 : i64, scratch_operands = 1 : i64, tpu.core_type = #tpu.core_type<tc>, window_params = [{transform_indices = @transform_0, window_bounds = array<i64: 32, 32>}, {transform_indices = @transform_1, window_bounds = array<i64: 32, 32>}, {transform_indices = @transform_2, window_bounds = array<i64: 1, 32>}, {transform_indices = @transform_3, window_bounds = array<i64: 32, 32>}]} {
    %c0_i32 = arith.constant 0 : i32
    %0 = arith.cmpi eq, %arg2, %c0_i32 : i32
    %1 = arith.extui %0 : i1 to i32
    %c0_i32_0 = arith.constant 0 : i32
    %2 = arith.cmpi ne, %1, %c0_i32_0 : i32
    scf.if %2 {
      %cst_10 = arith.constant 0.000000e+00 : f32
      %12 = vector.broadcast %cst_10 : f32 to vector<32x32xf32>
      %c0_11 = arith.constant 0 : index
      %c0_12 = arith.constant 0 : index
      %13 = vector.load %arg7[%c0_11, %c0_12] : memref<32x32xf32, #tpu.memory_space<vmem>>, vector<32x32xf32>
      tpu.vector_store %arg7[%c0_11, %c0_12], %12 {strides = array<i32>} : memref<32x32xf32, #tpu.memory_space<vmem>>, vector<32x32xf32>,
    } else {
    }
    %c0 = arith.constant 0 : index
    %c0_1 = arith.constant 0 : index
    %3 = vector.load %arg7[%c0, %c0_1] : memref<32x32xf32, #tpu.memory_space<vmem>>, vector<32x32xf32>
    %c0_2 = arith.constant 0 : index
    %c0_3 = arith.constant 0 : index
    %4 = vector.load %arg3[%c0_2, %c0_3] : memref<32x32xbf16, #tpu.memory_space<vmem>>, vector<32x32xbf16>
    %c0_4 = arith.constant 0 : index
    %c0_5 = arith.constant 0 : index
    %5 = vector.load %arg4[%c0_4, %c0_5] : memref<32x32xbf16, #tpu.memory_space<vmem>>, vector<32x32xbf16>
    %cst = arith.constant dense<0.000000e+00> : vector<32x32xf32>
    %6 = tpu.matmul %4, %5, %cst {dimension_numbers = #tpu.dot_dimension_numbers<[1], [0], [0], [1], [0, 0, 1, 1], [], []>} : vector<32x32xbf16>, vector<32x32xbf16>, vector<32x32xf32> -> vector<32x32xf32>
    %7 = arith.addf %3, %6 : vector<32x32xf32>
    %c0_6 = arith.constant 0 : index
    %c0_7 = arith.constant 0 : index
    %8 = vector.load %arg7[%c0_6, %c0_7] : memref<32x32xf32, #tpu.memory_space<vmem>>, vector<32x32xf32>
    tpu.vector_store %arg7[%c0_6, %c0_7], %7 {strides = array<i32>} : memref<32x32xf32, #tpu.memory_space<vmem>>, vector<32x32xf32>,
    %c0_i32_8 = arith.constant 0 : i32
    %9 = arith.cmpi eq, %arg2, %c0_i32_8 : i32
    %10 = arith.extui %9 : i1 to i32
    %c0_i32_9 = arith.constant 0 : i32
    %11 = arith.cmpi ne, %10, %c0_i32_9 : i32
    scf.if %11 {
      %c0_10 = arith.constant 0 : index
      %c0_11 = arith.constant 0 : index
      %12 = vector.load %arg7[%c0_10, %c0_11] : memref<32x32xf32, #tpu.memory_space<vmem>>, vector<32x32xf32>
      %c0_12 = arith.constant 0 : index
      %c0_13 = arith.constant 0 : index
      %13 = vector.load %arg5[%c0_12, %c0_13] : memref<1x32xf32, #tpu.memory_space<vmem>>, vector<1x32xf32>
      %14 = vector.broadcast %13 : vector<1x32xf32> to vector<32x32xf32>
      %15 = arith.addf %12, %14 : vector<32x32xf32>
      %16 = arith.truncf %15 : vector<32x32xf32> to vector<32x32xbf16>
      %c0_14 = arith.constant 0 : index
      %c0_15 = arith.constant 0 : index
      %17 = vector.load %arg6[%c0_14, %c0_15] : memref<32x32xbf16, #tpu.memory_space<vmem>>, vector<32x32xbf16>
      tpu.vector_store %arg6[%c0_14, %c0_15], %16 {strides = array<i32>} : memref<32x32xbf16, #tpu.memory_space<vmem>>, vector<32x32xbf16>,
    } else {
    }
    return
  }
  func.func @transform_0(%arg0: i32, %arg1: i32, %arg2: i32) -> (i32, i32) {
    %c0_i32 = arith.constant 0 : i32
    return %arg0, %arg2 : i32, i32
  }
  func.func @transform_1(%arg0: i32, %arg1: i32, %arg2: i32) -> (i32, i32) {
    %c0_i32 = arith.constant 0 : i32
    return %arg2, %arg1 : i32, i32
  }
  func.func @transform_2(%arg0: i32, %arg1: i32, %arg2: i32) -> (i32, i32) {
    %c0_i32 = arith.constant 0 : i32
    %c0_i32_0 = arith.constant 0 : i32
    return %c0_i32, %arg1 : i32, i32
  }
  func.func @transform_3(%arg0: i32, %arg1: i32, %arg2: i32) -> (i32, i32) {
    %c0_i32 = arith.constant 0 : i32
    return %arg0, %arg1 : i32, i32
  }
}

module attributes {stable_mosaic.version = 11 : i64} {
  func.func @_attn_kernel(%arg0: i32, %arg1: i32, %arg2: memref<1x16x32xbf16, #tpu.memory_space<vmem>>, %arg3: memref<1x16x64xbf16, #tpu.memory_space<vmem>>, %arg4: memref<1x16x64xbf16, #tpu.memory_space<vmem>>, %arg5: memref<8x16xbf16, #tpu.memory_space<vmem>>, %arg6: memref<32x32xbf16, #tpu.memory_space<vmem>>, %arg7: memref<1x16x32xbf16, #tpu.memory_space<vmem>>, %arg8: memref<1x32xf32, #tpu.memory_space<vmem>>, %arg9: memref<1x32xf32, #tpu.memory_space<vmem>>, %arg10: memref<1x16x32xbf16, #tpu.memory_space<vmem>>) attributes {dimension_semantics = [#tpu.dimension_semantics<parallel>, #tpu.dimension_semantics<parallel>], iteration_bounds = array<i64: 2, 1>, scalar_prefetch = 0 : i64, scratch_operands = 0 : i64, tpu.core_type = #tpu.core_type<tc>, window_params = [{transform_indices = @transform_0, window_bounds = array<i64: 1, 16, 32>}, {transform_indices = @transform_1, window_bounds = array<i64: 1, 16, 64>}, {transform_indices = @transform_2, window_bounds = array<i64: 1, 16, 64>}, {pipeline_mode = #tpu.pipeline_mode<synchronous>, transform_indices = @transform_3, window_bounds = array<i64: 8, 16>}, {pipeline_mode = #tpu.pipeline_mode<synchronous>, transform_indices = @transform_4, window_bounds = array<i64: 32, 32>}, {transform_indices = @transform_5, window_bounds = array<i64: 1, 16, 32>}, {pipeline_mode = #tpu.pipeline_mode<synchronous>, transform_indices = @transform_6, window_bounds = array<i64: 1, 32>}, {pipeline_mode = #tpu.pipeline_mode<synchronous>, transform_indices = @transform_7, window_bounds = array<i64: 1, 32>}, {transform_indices = @transform_8, window_bounds = array<i64: 1, 16, 32>}]} {
    %c0 = arith.constant 0 : index
    %c0_0 = arith.constant 0 : index
    %c0_1 = arith.constant 0 : index
    %0 = vector.load %arg2[%c0, %c0_0, %c0_1] : memref<1x16x32xbf16, #tpu.memory_space<vmem>>, vector<1x16x32xbf16>
    %1 = vector.shape_cast %0 : vector<1x16x32xbf16> to vector<16x32xbf16>
    %c0_2 = arith.constant 0 : index
    %c0_3 = arith.constant 0 : index
    %c0_4 = arith.constant 0 : index
    %2 = vector.load %arg3[%c0_2, %c0_3, %c0_4] : memref<1x16x64xbf16, #tpu.memory_space<vmem>>, vector<1x16x64xbf16>
    %3 = vector.shape_cast %2 : vector<1x16x64xbf16> to vector<16x64xbf16>
    %c0_5 = arith.constant 0 : index
    %c0_6 = arith.constant 0 : index
    %c0_7 = arith.constant 0 : index
    %4 = vector.load %arg4[%c0_5, %c0_6, %c0_7] : memref<1x16x64xbf16, #tpu.memory_space<vmem>>, vector<1x16x64xbf16>
    %5 = vector.shape_cast %4 : vector<1x16x64xbf16> to vector<16x64xbf16>
    %6 = tpu.concatenate %3, %5 in 0 : vector<16x64xbf16>, vector<16x64xbf16> -> vector<32x64xbf16>
    %c0_8 = arith.constant 0 : index
    %c0_9 = arith.constant 0 : index
    %7 = vector.load %arg5[%c0_8, %c0_9] : memref<8x16xbf16, #tpu.memory_space<vmem>>, vector<8x16xbf16>
    %8 = tpu.iota {dimensions = array<i32: 0>} : vector<16x32xi32>
    %9 = tpu.iota {dimensions = array<i32: 1>} : vector<16x32xi32>
    %10 = arith.subi %9, %8 : vector<16x32xi32>
    %c0_i32 = arith.constant 0 : i32
    %11 = vector.broadcast %c0_i32 : i32 to vector<16x32xi32>
    %12 = arith.cmpi sge, %10, %11 : vector<16x32xi32>
    %c16_i32 = arith.constant 16 : i32
    %13 = vector.broadcast %c16_i32 : i32 to vector<16x32xi32>
    %14 = arith.cmpi slt, %10, %13 : vector<16x32xi32>
    %15 = arith.andi %12, %14 : vector<16x32xi1>
    %16 = tpu.iota {dimensions = array<i32: 0>} : vector<16x1xi32>
    %c1_i32 = arith.constant 1 : i32
    %17 = vector.broadcast %c1_i32 : i32 to vector<16x1xi32>
    %18 = arith.andi %16, %17 : vector<16x1xi32>
    %c0_i32_10 = arith.constant 0 : i32
    %19 = vector.broadcast %c0_i32_10 : i32 to vector<16x1xi32>
    %20 = arith.cmpi ne, %18, %19 : vector<16x1xi32>
    %21 = vector.shape_cast %20 : vector<16x1xi1> to vector<16x1xi1>
    %22 = vector.broadcast %21 : vector<16x1xi1> to vector<16x32xi1>
    %c2_i32 = arith.constant 2 : i32
    %23 = vector.broadcast %c2_i32 : i32 to vector<16x1xi32>
    %24 = arith.andi %16, %23 : vector<16x1xi32>
    %c0_i32_11 = arith.constant 0 : i32
    %25 = vector.broadcast %c0_i32_11 : i32 to vector<16x1xi32>
    %26 = arith.cmpi ne, %24, %25 : vector<16x1xi32>
    %27 = vector.shape_cast %26 : vector<16x1xi1> to vector<16x1xi1>
    %28 = vector.broadcast %27 : vector<16x1xi1> to vector<16x32xi1>
    %c4_i32 = arith.constant 4 : i32
    %29 = vector.broadcast %c4_i32 : i32 to vector<16x1xi32>
    %30 = arith.andi %16, %29 : vector<16x1xi32>
    %c0_i32_12 = arith.constant 0 : i32
    %31 = vector.broadcast %c0_i32_12 : i32 to vector<16x1xi32>
    %32 = arith.cmpi ne, %30, %31 : vector<16x1xi32>
    %33 = vector.shape_cast %32 : vector<16x1xi1> to vector<16x1xi1>
    %34 = vector.broadcast %33 : vector<16x1xi1> to vector<16x32xi1>
    %c8_i32 = arith.constant 8 : i32
    %35 = vector.broadcast %c8_i32 : i32 to vector<16x1xi32>
    %36 = arith.andi %16, %35 : vector<16x1xi32>
    %c0_i32_13 = arith.constant 0 : i32
    %37 = vector.broadcast %c0_i32_13 : i32 to vector<16x1xi32>
    %38 = arith.cmpi ne, %36, %37 : vector<16x1xi32>
    %39 = vector.shape_cast %38 : vector<16x1xi1> to vector<16x1xi1>
    %40 = vector.broadcast %39 : vector<16x1xi1> to vector<16x32xi1>
    %41 = vector.extract_strided_slice %1 {offsets = [0, 0], sizes = [16, 8], strides = [1, 1]} : vector<16x32xbf16> to vector<16x8xbf16>
    %42 = vector.extract_strided_slice %6 {offsets = [0, 0], sizes = [32, 8], strides = [1, 1]} : vector<32x64xbf16> to vector<32x8xbf16>
    %43 = vector.extract_strided_slice %6 {offsets = [0, 32], sizes = [32, 8], strides = [1, 1]} : vector<32x64xbf16> to vector<32x8xbf16>
    %cst = arith.constant dense<0.000000e+00> : vector<16x32xf32>
    %44 = tpu.matmul %41, %42, %cst {dimension_numbers = #tpu.dot_dimension_numbers<[1], [1], [0], [0], [0, 0, 1, 0], [], []>} : vector<16x8xbf16>, vector<32x8xbf16>, vector<16x32xf32> -> vector<16x32xf32>
    %cst_14 = arith.constant dense<0.000000e+00> : vector<16x16xf32>
    %45 = tpu.matmul %41, %7, %cst_14 {dimension_numbers = #tpu.dot_dimension_numbers<[1], [0], [0], [1], [0, 0, 1, 1], [], []>} : vector<16x8xbf16>, vector<8x16xbf16>, vector<16x16xf32> -> vector<16x16xf32>
    %cst_15 = arith.constant 0.000000e+00 : f32
    %46 = vector.broadcast %cst_15 : f32 to vector<16x16xf32>
    %47 = tpu.concatenate %45, %46 in 1 : vector<16x16xf32>, vector<16x16xf32> -> vector<16x32xf32>
    %48 = vector.extract_strided_slice %47 {offsets = [0, 31], sizes = [16, 1], strides = [1, 1]} : vector<16x32xf32> to vector<16x1xf32>
    %49 = vector.extract_strided_slice %47 {offsets = [0, 0], sizes = [16, 31], strides = [1, 1]} : vector<16x32xf32> to vector<16x31xf32>
    %50 = tpu.concatenate %48, %49 in 1 : vector<16x1xf32>, vector<16x31xf32> -> vector<16x32xf32>
    %51 = arith.select %22, %50, %47 : vector<16x32xi1>, vector<16x32xf32>
    %52 = vector.extract_strided_slice %51 {offsets = [0, 30], sizes = [16, 2], strides = [1, 1]} : vector<16x32xf32> to vector<16x2xf32>
    %53 = vector.extract_strided_slice %51 {offsets = [0, 0], sizes = [16, 30], strides = [1, 1]} : vector<16x32xf32> to vector<16x30xf32>
    %54 = tpu.concatenate %52, %53 in 1 : vector<16x2xf32>, vector<16x30xf32> -> vector<16x32xf32>
    %55 = arith.select %28, %54, %51 : vector<16x32xi1>, vector<16x32xf32>
    %56 = vector.extract_strided_slice %55 {offsets = [0, 28], sizes = [16, 4], strides = [1, 1]} : vector<16x32xf32> to vector<16x4xf32>
    %57 = vector.extract_strided_slice %55 {offsets = [0, 0], sizes = [16, 28], strides = [1, 1]} : vector<16x32xf32> to vector<16x28xf32>
    %58 = tpu.concatenate %56, %57 in 1 : vector<16x4xf32>, vector<16x28xf32> -> vector<16x32xf32>
    %59 = arith.select %34, %58, %55 : vector<16x32xi1>, vector<16x32xf32>
    %60 = vector.extract_strided_slice %59 {offsets = [0, 24], sizes = [16, 8], strides = [1, 1]} : vector<16x32xf32> to vector<16x8xf32>
    %61 = vector.extract_strided_slice %59 {offsets = [0, 0], sizes = [16, 24], strides = [1, 1]} : vector<16x32xf32> to vector<16x24xf32>
    %62 = tpu.concatenate %60, %61 in 1 : vector<16x8xf32>, vector<16x24xf32> -> vector<16x32xf32>
    %63 = arith.select %40, %62, %59 : vector<16x32xi1>, vector<16x32xf32>
    %64 = arith.addf %44, %63 : vector<16x32xf32>
    %cst_16 = arith.constant -1.000000e+30 : f32
    %65 = vector.broadcast %cst_16 : f32 to vector<16x32xf32>
    %66 = arith.select %15, %64, %65 : vector<16x32xi1>, vector<16x32xf32>
    %cst_17 = arith.constant dense<0xFF800000> : vector<16xf32>
    %67 = vector.multi_reduction <maximumf>, %66, %cst_17 [1] : vector<16x32xf32> to vector<16xf32>
    %68 = vector.shape_cast %67 : vector<16xf32> to vector<16x1xf32>
    %69 = vector.broadcast %68 : vector<16x1xf32> to vector<16x32xf32>
    %70 = arith.subf %66, %69 : vector<16x32xf32>
    %71 = math.exp %70 : vector<16x32xf32>
    %cst_18 = arith.constant dense<0.000000e+00> : vector<16xf32>
    %72 = vector.multi_reduction <add>, %71, %cst_18 [1] : vector<16x32xf32> to vector<16xf32>
    %73 = vector.shape_cast %72 : vector<16xf32> to vector<16x1xf32>
    %74 = tpu.reciprocal %73 {approx = true} : vector<16x1xf32> -> vector<16x1xf32>
    %75 = vector.broadcast %74 : vector<16x1xf32> to vector<16x32xf32>
    %76 = arith.mulf %71, %75 : vector<16x32xf32>
    %77 = arith.truncf %76 : vector<16x32xf32> to vector<16x32xbf16>
    %cst_19 = arith.constant dense<0.000000e+00> : vector<16x8xf32>
    %78 = tpu.matmul %77, %43, %cst_19 {dimension_numbers = #tpu.dot_dimension_numbers<[1], [0], [0], [1], [0, 0, 1, 1], [], []>} : vector<16x32xbf16>, vector<32x8xbf16>, vector<16x8xf32> -> vector<16x8xf32>
    %79 = vector.extract_strided_slice %1 {offsets = [0, 8], sizes = [16, 8], strides = [1, 1]} : vector<16x32xbf16> to vector<16x8xbf16>
    %80 = vector.extract_strided_slice %6 {offsets = [0, 8], sizes = [32, 8], strides = [1, 1]} : vector<32x64xbf16> to vector<32x8xbf16>
    %81 = vector.extract_strided_slice %6 {offsets = [0, 40], sizes = [32, 8], strides = [1, 1]} : vector<32x64xbf16> to vector<32x8xbf16>
    %cst_20 = arith.constant dense<0.000000e+00> : vector<16x32xf32>
    %82 = tpu.matmul %79, %80, %cst_20 {dimension_numbers = #tpu.dot_dimension_numbers<[1], [1], [0], [0], [0, 0, 1, 0], [], []>} : vector<16x8xbf16>, vector<32x8xbf16>, vector<16x32xf32> -> vector<16x32xf32>
    %cst_21 = arith.constant dense<0.000000e+00> : vector<16x16xf32>
    %83 = tpu.matmul %79, %7, %cst_21 {dimension_numbers = #tpu.dot_dimension_numbers<[1], [0], [0], [1], [0, 0, 1, 1], [], []>} : vector<16x8xbf16>, vector<8x16xbf16>, vector<16x16xf32> -> vector<16x16xf32>
    %cst_22 = arith.constant 0.000000e+00 : f32
    %84 = vector.broadcast %cst_22 : f32 to vector<16x16xf32>
    %85 = tpu.concatenate %83, %84 in 1 : vector<16x16xf32>, vector<16x16xf32> -> vector<16x32xf32>
    %86 = vector.extract_strided_slice %85 {offsets = [0, 31], sizes = [16, 1], strides = [1, 1]} : vector<16x32xf32> to vector<16x1xf32>
    %87 = vector.extract_strided_slice %85 {offsets = [0, 0], sizes = [16, 31], strides = [1, 1]} : vector<16x32xf32> to vector<16x31xf32>
    %88 = tpu.concatenate %86, %87 in 1 : vector<16x1xf32>, vector<16x31xf32> -> vector<16x32xf32>
    %89 = arith.select %22, %88, %85 : vector<16x32xi1>, vector<16x32xf32>
    %90 = vector.extract_strided_slice %89 {offsets = [0, 30], sizes = [16, 2], strides = [1, 1]} : vector<16x32xf32> to vector<16x2xf32>
    %91 = vector.extract_strided_slice %89 {offsets = [0, 0], sizes = [16, 30], strides = [1, 1]} : vector<16x32xf32> to vector<16x30xf32>
    %92 = tpu.concatenate %90, %91 in 1 : vector<16x2xf32>, vector<16x30xf32> -> vector<16x32xf32>
    %93 = arith.select %28, %92, %89 : vector<16x32xi1>, vector<16x32xf32>
    %94 = vector.extract_strided_slice %93 {offsets = [0, 28], sizes = [16, 4], strides = [1, 1]} : vector<16x32xf32> to vector<16x4xf32>
    %95 = vector.extract_strided_slice %93 {offsets = [0, 0], sizes = [16, 28], strides = [1, 1]} : vector<16x32xf32> to vector<16x28xf32>
    %96 = tpu.concatenate %94, %95 in 1 : vector<16x4xf32>, vector<16x28xf32> -> vector<16x32xf32>
    %97 = arith.select %34, %96, %93 : vector<16x32xi1>, vector<16x32xf32>
    %98 = vector.extract_strided_slice %97 {offsets = [0, 24], sizes = [16, 8], strides = [1, 1]} : vector<16x32xf32> to vector<16x8xf32>
    %99 = vector.extract_strided_slice %97 {offsets = [0, 0], sizes = [16, 24], strides = [1, 1]} : vector<16x32xf32> to vector<16x24xf32>
    %100 = tpu.concatenate %98, %99 in 1 : vector<16x8xf32>, vector<16x24xf32> -> vector<16x32xf32>
    %101 = arith.select %40, %100, %97 : vector<16x32xi1>, vector<16x32xf32>
    %102 = arith.addf %82, %101 : vector<16x32xf32>
    %cst_23 = arith.constant -1.000000e+30 : f32
    %103 = vector.broadcast %cst_23 : f32 to vector<16x32xf32>
    %104 = arith.select %15, %102, %103 : vector<16x32xi1>, vector<16x32xf32>
    %cst_24 = arith.constant dense<0xFF800000> : vector<16xf32>
    %105 = vector.multi_reduction <maximumf>, %104, %cst_24 [1] : vector<16x32xf32> to vector<16xf32>
    %106 = vector.shape_cast %105 : vector<16xf32> to vector<16x1xf32>
    %107 = vector.broadcast %106 : vector<16x1xf32> to vector<16x32xf32>
    %108 = arith.subf %104, %107 : vector<16x32xf32>
    %109 = math.exp %108 : vector<16x32xf32>
    %cst_25 = arith.constant dense<0.000000e+00> : vector<16xf32>
    %110 = vector.multi_reduction <add>, %109, %cst_25 [1] : vector<16x32xf32> to vector<16xf32>
    %111 = vector.shape_cast %110 : vector<16xf32> to vector<16x1xf32>
    %112 = tpu.reciprocal %111 {approx = true} : vector<16x1xf32> -> vector<16x1xf32>
    %113 = vector.broadcast %112 : vector<16x1xf32> to vector<16x32xf32>
    %114 = arith.mulf %109, %113 : vector<16x32xf32>
    %115 = arith.truncf %114 : vector<16x32xf32> to vector<16x32xbf16>
    %cst_26 = arith.constant dense<0.000000e+00> : vector<16x8xf32>
    %116 = tpu.matmul %115, %81, %cst_26 {dimension_numbers = #tpu.dot_dimension_numbers<[1], [0], [0], [1], [0, 0, 1, 1], [], []>} : vector<16x32xbf16>, vector<32x8xbf16>, vector<16x8xf32> -> vector<16x8xf32>
    %117 = vector.extract_strided_slice %1 {offsets = [0, 16], sizes = [16, 8], strides = [1, 1]} : vector<16x32xbf16> to vector<16x8xbf16>
    %118 = vector.extract_strided_slice %6 {offsets = [0, 16], sizes = [32, 8], strides = [1, 1]} : vector<32x64xbf16> to vector<32x8xbf16>
    %119 = vector.extract_strided_slice %6 {offsets = [0, 48], sizes = [32, 8], strides = [1, 1]} : vector<32x64xbf16> to vector<32x8xbf16>
    %cst_27 = arith.constant dense<0.000000e+00> : vector<16x32xf32>
    %120 = tpu.matmul %117, %118, %cst_27 {dimension_numbers = #tpu.dot_dimension_numbers<[1], [1], [0], [0], [0, 0, 1, 0], [], []>} : vector<16x8xbf16>, vector<32x8xbf16>, vector<16x32xf32> -> vector<16x32xf32>
    %cst_28 = arith.constant dense<0.000000e+00> : vector<16x16xf32>
    %121 = tpu.matmul %117, %7, %cst_28 {dimension_numbers = #tpu.dot_dimension_numbers<[1], [0], [0], [1], [0, 0, 1, 1], [], []>} : vector<16x8xbf16>, vector<8x16xbf16>, vector<16x16xf32> -> vector<16x16xf32>
    %cst_29 = arith.constant 0.000000e+00 : f32
    %122 = vector.broadcast %cst_29 : f32 to vector<16x16xf32>
    %123 = tpu.concatenate %121, %122 in 1 : vector<16x16xf32>, vector<16x16xf32> -> vector<16x32xf32>
    %124 = vector.extract_strided_slice %123 {offsets = [0, 31], sizes = [16, 1], strides = [1, 1]} : vector<16x32xf32> to vector<16x1xf32>
    %125 = vector.extract_strided_slice %123 {offsets = [0, 0], sizes = [16, 31], strides = [1, 1]} : vector<16x32xf32> to vector<16x31xf32>
    %126 = tpu.concatenate %124, %125 in 1 : vector<16x1xf32>, vector<16x31xf32> -> vector<16x32xf32>
    %127 = arith.select %22, %126, %123 : vector<16x32xi1>, vector<16x32xf32>
    %128 = vector.extract_strided_slice %127 {offsets = [0, 30], sizes = [16, 2], strides = [1, 1]} : vector<16x32xf32> to vector<16x2xf32>
    %129 = vector.extract_strided_slice %127 {offsets = [0, 0], sizes = [16, 30], strides = [1, 1]} : vector<16x32xf32> to vector<16x30xf32>
    %130 = tpu.concatenate %128, %129 in 1 : vector<16x2xf32>, vector<16x30xf32> -> vector<16x32xf32>
    %131 = arith.select %28, %130, %127 : vector<16x32xi1>, vector<16x32xf32>
    %132 = vector.extract_strided_slice %131 {offsets = [0, 28], sizes = [16, 4], strides = [1, 1]} : vector<16x32xf32> to vector<16x4xf32>
    %133 = vector.extract_strided_slice %131 {offsets = [0, 0], sizes = [16, 28], strides = [1, 1]} : vector<16x32xf32> to vector<16x28xf32>
    %134 = tpu.concatenate %132, %133 in 1 : vector<16x4xf32>, vector<16x28xf32> -> vector<16x32xf32>
    %135 = arith.select %34, %134, %131 : vector<16x32xi1>, vector<16x32xf32>
    %136 = vector.extract_strided_slice %135 {offsets = [0, 24], sizes = [16, 8], strides = [1, 1]} : vector<16x32xf32> to vector<16x8xf32>
    %137 = vector.extract_strided_slice %135 {offsets = [0, 0], sizes = [16, 24], strides = [1, 1]} : vector<16x32xf32> to vector<16x24xf32>
    %138 = tpu.concatenate %136, %137 in 1 : vector<16x8xf32>, vector<16x24xf32> -> vector<16x32xf32>
    %139 = arith.select %40, %138, %135 : vector<16x32xi1>, vector<16x32xf32>
    %140 = arith.addf %120, %139 : vector<16x32xf32>
    %cst_30 = arith.constant -1.000000e+30 : f32
    %141 = vector.broadcast %cst_30 : f32 to vector<16x32xf32>
    %142 = arith.select %15, %140, %141 : vector<16x32xi1>, vector<16x32xf32>
    %cst_31 = arith.constant dense<0xFF800000> : vector<16xf32>
    %143 = vector.multi_reduction <maximumf>, %142, %cst_31 [1] : vector<16x32xf32> to vector<16xf32>
    %144 = vector.shape_cast %143 : vector<16xf32> to vector<16x1xf32>
    %145 = vector.broadcast %144 : vector<16x1xf32> to vector<16x32xf32>
    %146 = arith.subf %142, %145 : vector<16x32xf32>
    %147 = math.exp %146 : vector<16x32xf32>
    %cst_32 = arith.constant dense<0.000000e+00> : vector<16xf32>
    %148 = vector.multi_reduction <add>, %147, %cst_32 [1] : vector<16x32xf32> to vector<16xf32>
    %149 = vector.shape_cast %148 : vector<16xf32> to vector<16x1xf32>
    %150 = tpu.reciprocal %149 {approx = true} : vector<16x1xf32> -> vector<16x1xf32>
    %151 = vector.broadcast %150 : vector<16x1xf32> to vector<16x32xf32>
    %152 = arith.mulf %147, %151 : vector<16x32xf32>
    %153 = arith.truncf %152 : vector<16x32xf32> to vector<16x32xbf16>
    %cst_33 = arith.constant dense<0.000000e+00> : vector<16x8xf32>
    %154 = tpu.matmul %153, %119, %cst_33 {dimension_numbers = #tpu.dot_dimension_numbers<[1], [0], [0], [1], [0, 0, 1, 1], [], []>} : vector<16x32xbf16>, vector<32x8xbf16>, vector<16x8xf32> -> vector<16x8xf32>
    %155 = vector.extract_strided_slice %1 {offsets = [0, 24], sizes = [16, 8], strides = [1, 1]} : vector<16x32xbf16> to vector<16x8xbf16>
    %156 = vector.extract_strided_slice %6 {offsets = [0, 24], sizes = [32, 8], strides = [1, 1]} : vector<32x64xbf16> to vector<32x8xbf16>
    %157 = vector.extract_strided_slice %6 {offsets = [0, 56], sizes = [32, 8], strides = [1, 1]} : vector<32x64xbf16> to vector<32x8xbf16>
    %cst_34 = arith.constant dense<0.000000e+00> : vector<16x32xf32>
    %158 = tpu.matmul %155, %156, %cst_34 {dimension_numbers = #tpu.dot_dimension_numbers<[1], [1], [0], [0], [0, 0, 1, 0], [], []>} : vector<16x8xbf16>, vector<32x8xbf16>, vector<16x32xf32> -> vector<16x32xf32>
    %cst_35 = arith.constant dense<0.000000e+00> : vector<16x16xf32>
    %159 = tpu.matmul %155, %7, %cst_35 {dimension_numbers = #tpu.dot_dimension_numbers<[1], [0], [0], [1], [0, 0, 1, 1], [], []>} : vector<16x8xbf16>, vector<8x16xbf16>, vector<16x16xf32> -> vector<16x16xf32>
    %cst_36 = arith.constant 0.000000e+00 : f32
    %160 = vector.broadcast %cst_36 : f32 to vector<16x16xf32>
    %161 = tpu.concatenate %159, %160 in 1 : vector<16x16xf32>, vector<16x16xf32> -> vector<16x32xf32>
    %162 = vector.extract_strided_slice %161 {offsets = [0, 31], sizes = [16, 1], strides = [1, 1]} : vector<16x32xf32> to vector<16x1xf32>
    %163 = vector.extract_strided_slice %161 {offsets = [0, 0], sizes = [16, 31], strides = [1, 1]} : vector<16x32xf32> to vector<16x31xf32>
    %164 = tpu.concatenate %162, %163 in 1 : vector<16x1xf32>, vector<16x31xf32> -> vector<16x32xf32>
    %165 = arith.select %22, %164, %161 : vector<16x32xi1>, vector<16x32xf32>
    %166 = vector.extract_strided_slice %165 {offsets = [0, 30], sizes = [16, 2], strides = [1, 1]} : vector<16x32xf32> to vector<16x2xf32>
    %167 = vector.extract_strided_slice %165 {offsets = [0, 0], sizes = [16, 30], strides = [1, 1]} : vector<16x32xf32> to vector<16x30xf32>
    %168 = tpu.concatenate %166, %167 in 1 : vector<16x2xf32>, vector<16x30xf32> -> vector<16x32xf32>
    %169 = arith.select %28, %168, %165 : vector<16x32xi1>, vector<16x32xf32>
    %170 = vector.extract_strided_slice %169 {offsets = [0, 28], sizes = [16, 4], strides = [1, 1]} : vector<16x32xf32> to vector<16x4xf32>
    %171 = vector.extract_strided_slice %169 {offsets = [0, 0], sizes = [16, 28], strides = [1, 1]} : vector<16x32xf32> to vector<16x28xf32>
    %172 = tpu.concatenate %170, %171 in 1 : vector<16x4xf32>, vector<16x28xf32> -> vector<16x32xf32>
    %173 = arith.select %34, %172, %169 : vector<16x32xi1>, vector<16x32xf32>
    %174 = vector.extract_strided_slice %173 {offsets = [0, 24], sizes = [16, 8], strides = [1, 1]} : vector<16x32xf32> to vector<16x8xf32>
    %175 = vector.extract_strided_slice %173 {offsets = [0, 0], sizes = [16, 24], strides = [1, 1]} : vector<16x32xf32> to vector<16x24xf32>
    %176 = tpu.concatenate %174, %175 in 1 : vector<16x8xf32>, vector<16x24xf32> -> vector<16x32xf32>
    %177 = arith.select %40, %176, %173 : vector<16x32xi1>, vector<16x32xf32>
    %178 = arith.addf %158, %177 : vector<16x32xf32>
    %cst_37 = arith.constant -1.000000e+30 : f32
    %179 = vector.broadcast %cst_37 : f32 to vector<16x32xf32>
    %180 = arith.select %15, %178, %179 : vector<16x32xi1>, vector<16x32xf32>
    %cst_38 = arith.constant dense<0xFF800000> : vector<16xf32>
    %181 = vector.multi_reduction <maximumf>, %180, %cst_38 [1] : vector<16x32xf32> to vector<16xf32>
    %182 = vector.shape_cast %181 : vector<16xf32> to vector<16x1xf32>
    %183 = vector.broadcast %182 : vector<16x1xf32> to vector<16x32xf32>
    %184 = arith.subf %180, %183 : vector<16x32xf32>
    %185 = math.exp %184 : vector<16x32xf32>
    %cst_39 = arith.constant dense<0.000000e+00> : vector<16xf32>
    %186 = vector.multi_reduction <add>, %185, %cst_39 [1] : vector<16x32xf32> to vector<16xf32>
    %187 = vector.shape_cast %186 : vector<16xf32> to vector<16x1xf32>
    %188 = tpu.reciprocal %187 {approx = true} : vector<16x1xf32> -> vector<16x1xf32>
    %189 = vector.broadcast %188 : vector<16x1xf32> to vector<16x32xf32>
    %190 = arith.mulf %185, %189 : vector<16x32xf32>
    %191 = arith.truncf %190 : vector<16x32xf32> to vector<16x32xbf16>
    %cst_40 = arith.constant dense<0.000000e+00> : vector<16x8xf32>
    %192 = tpu.matmul %191, %157, %cst_40 {dimension_numbers = #tpu.dot_dimension_numbers<[1], [0], [0], [1], [0, 0, 1, 1], [], []>} : vector<16x32xbf16>, vector<32x8xbf16>, vector<16x8xf32> -> vector<16x8xf32>
    %193 = tpu.concatenate %78, %116, %154, %192 in 1 : vector<16x8xf32>, vector<16x8xf32>, vector<16x8xf32>, vector<16x8xf32> -> vector<16x32xf32>
    %194 = arith.truncf %193 : vector<16x32xf32> to vector<16x32xbf16>
    %c0_41 = arith.constant 0 : index
    %c0_42 = arith.constant 0 : index
    %195 = vector.load %arg6[%c0_41, %c0_42] : memref<32x32xbf16, #tpu.memory_space<vmem>>, vector<32x32xbf16>
    %cst_43 = arith.constant dense<0.000000e+00> : vector<16x32xf32>
    %196 = tpu.matmul %194, %195, %cst_43 {dimension_numbers = #tpu.dot_dimension_numbers<[1], [0], [0], [1], [0, 0, 1, 1], [], []>} : vector<16x32xbf16>, vector<32x32xbf16>, vector<16x32xf32> -> vector<16x32xf32>
    %c0_44 = arith.constant 0 : index
    %c0_45 = arith.constant 0 : index
    %c0_46 = arith.constant 0 : index
    %197 = vector.load %arg7[%c0_44, %c0_45, %c0_46] : memref<1x16x32xbf16, #tpu.memory_space<vmem>>, vector<1x16x32xbf16>
    %198 = vector.shape_cast %197 : vector<1x16x32xbf16> to vector<16x32xbf16>
    %199 = arith.extf %198 : vector<16x32xbf16> to vector<16x32xf32>
    %200 = arith.addf %196, %199 : vector<16x32xf32>
    %cst_47 = arith.constant dense<0.000000e+00> : vector<16xf32>
    %201 = vector.multi_reduction <add>, %200, %cst_47 [1] : vector<16x32xf32> to vector<16xf32>
    %202 = vector.shape_cast %201 : vector<16xf32> to vector<16x1xf32>
    %cst_48 = arith.constant 3.200000e+01 : f32
    %203 = vector.broadcast %cst_48 : f32 to vector<16x1xf32>
    %204 = arith.divf %202, %203 : vector<16x1xf32>
    %205 = vector.broadcast %204 : vector<16x1xf32> to vector<16x32xf32>
    %206 = arith.subf %200, %205 : vector<16x32xf32>
    %207 = arith.mulf %206, %206 : vector<16x32xf32>
    %cst_49 = arith.constant dense<0.000000e+00> : vector<16xf32>
    %208 = vector.multi_reduction <add>, %207, %cst_49 [1] : vector<16x32xf32> to vector<16xf32>
    %209 = vector.shape_cast %208 : vector<16xf32> to vector<16x1xf32>
    %cst_50 = arith.constant 3.200000e+01 : f32
    %210 = vector.broadcast %cst_50 : f32 to vector<16x1xf32>
    %211 = arith.divf %209, %210 : vector<16x1xf32>
    %cst_51 = arith.constant 9.99999974E-6 : f32
    %212 = vector.broadcast %cst_51 : f32 to vector<16x1xf32>
    %213 = arith.addf %211, %212 : vector<16x1xf32>
    %214 = math.rsqrt %213 : vector<16x1xf32>
    %215 = vector.broadcast %214 : vector<16x1xf32> to vector<16x32xf32>
    %216 = arith.mulf %206, %215 : vector<16x32xf32>
    %c0_52 = arith.constant 0 : index
    %c0_53 = arith.constant 0 : index
    %217 = vector.load %arg8[%c0_52, %c0_53] : memref<1x32xf32, #tpu.memory_space<vmem>>, vector<1x32xf32>
    %218 = vector.broadcast %217 : vector<1x32xf32> to vector<16x32xf32>
    %219 = arith.mulf %216, %218 : vector<16x32xf32>
    %c0_54 = arith.constant 0 : index
    %c0_55 = arith.constant 0 : index
    %220 = vector.load %arg9[%c0_54, %c0_55] : memref<1x32xf32, #tpu.memory_space<vmem>>, vector<1x32xf32>
    %221 = vector.broadcast %220 : vector<1x32xf32> to vector<16x32xf32>
    %222 = arith.addf %219, %221 : vector<16x32xf32>
    %223 = arith.truncf %222 : vector<16x32xf32> to vector<16x32xbf16>
    %c0_56 = arith.constant 0 : index
    %c0_57 = arith.constant 0 : index
    %c0_58 = arith.constant 0 : index
    %224 = vector.load %arg10[%c0_56, %c0_57, %c0_58] : memref<1x16x32xbf16, #tpu.memory_space<vmem>>, vector<1x16x32xbf16>
    %225 = vector.shape_cast %224 : vector<1x16x32xbf16> to vector<16x32xbf16>
    %226 = vector.shape_cast %223 : vector<16x32xbf16> to vector<1x16x32xbf16>
    tpu.vector_store %arg10[%c0_56, %c0_57, %c0_58], %226 {strides = array<i32>} : memref<1x16x32xbf16, #tpu.memory_space<vmem>>, vector<1x16x32xbf16>,
    return
  }
  func.func @transform_0(%arg0: i32, %arg1: i32) -> (i32, i32, i32) {
    %c0_i32 = arith.constant 0 : i32
    %c0_i32_0 = arith.constant 0 : i32
    return %arg0, %arg1, %c0_i32 : i32, i32, i32
  }
  func.func @transform_1(%arg0: i32, %arg1: i32) -> (i32, i32, i32) {
    %c0_i32 = arith.constant 0 : i32
    %0 = arith.addi %arg1, %c0_i32 : i32
    %c0_i32_0 = arith.constant 0 : i32
    %c0_i32_1 = arith.constant 0 : i32
    return %arg0, %0, %c0_i32_0 : i32, i32, i32
  }
  func.func @transform_2(%arg0: i32, %arg1: i32) -> (i32, i32, i32) {
    %c1_i32 = arith.constant 1 : i32
    %0 = arith.addi %arg1, %c1_i32 : i32
    %c0_i32 = arith.constant 0 : i32
    %c0_i32_0 = arith.constant 0 : i32
    return %arg0, %0, %c0_i32 : i32, i32, i32
  }
  func.func @transform_3(%arg0: i32, %arg1: i32) -> (i32, i32) {
    %c0_i32 = arith.constant 0 : i32
    %c0_i32_0 = arith.constant 0 : i32
    %c0_i32_1 = arith.constant 0 : i32
    return %c0_i32, %c0_i32_0 : i32, i32
  }
  func.func @transform_4(%arg0: i32, %arg1: i32) -> (i32, i32) {
    %c0_i32 = arith.constant 0 : i32
    %c0_i32_0 = arith.constant 0 : i32
    %c0_i32_1 = arith.constant 0 : i32
    return %c0_i32, %c0_i32_0 : i32, i32
  }
  func.func @transform_5(%arg0: i32, %arg1: i32) -> (i32, i32, i32) {
    %c0_i32 = arith.constant 0 : i32
    %c0_i32_0 = arith.constant 0 : i32
    return %arg0, %arg1, %c0_i32 : i32, i32, i32
  }
  func.func @transform_6(%arg0: i32, %arg1: i32) -> (i32, i32) {
    %c0_i32 = arith.constant 0 : i32
    %c0_i32_0 = arith.constant 0 : i32
    %c0_i32_1 = arith.constant 0 : i32
    return %c0_i32, %c0_i32_0 : i32, i32
  }
  func.func @transform_7(%arg0: i32, %arg1: i32) -> (i32, i32) {
    %c0_i32 = arith.constant 0 : i32
    %c0_i32_0 = arith.constant 0 : i32
    %c0_i32_1 = arith.constant 0 : i32
    return %c0_i32, %c0_i32_0 : i32, i32
  }
  func.func @transform_8(%arg0: i32, %arg1: i32) -> (i32, i32, i32) {
    %c0_i32 = arith.constant 0 : i32
    %c0_i32_0 = arith.constant 0 : i32
    return %arg0, %arg1, %c0_i32 : i32, i32, i32
  }
}

module attributes {stable_mosaic.version = 11 : i64} {
  func.func @_matmul_kernel(%arg0: i32, %arg1: i32, %arg2: i32, %arg3: memref<32x32xbf16, #tpu.memory_space<vmem>>, %arg4: memref<32x64xbf16, #tpu.memory_space<vmem>>, %arg5: memref<1x64xf32, #tpu.memory_space<vmem>>, %arg6: memref<32x64xbf16, #tpu.memory_space<vmem>>, %arg7: memref<32x64xf32, #tpu.memory_space<vmem>>) attributes {dimension_semantics = [#tpu.dimension_semantics<parallel>, #tpu.dimension_semantics<parallel>, #tpu.dimension_semantics<arbitrary>], iteration_bounds = array<i64: 1, 1, 1>, scalar_prefetch = 0 : i64, scratch_operands = 1 : i64, tpu.core_type = #tpu.core_type<tc>, window_params = [{transform_indices = @transform_0, window_bounds = array<i64: 32, 32>}, {transform_indices = @transform_1, window_bounds = array<i64: 32, 64>}, {transform_indices = @transform_2, window_bounds = array<i64: 1, 64>}, {transform_indices = @transform_3, window_bounds = array<i64: 32, 64>}]} {
    %c0_i32 = arith.constant 0 : i32
    %0 = arith.cmpi eq, %arg2, %c0_i32 : i32
    %1 = arith.extui %0 : i1 to i32
    %c0_i32_0 = arith.constant 0 : i32
    %2 = arith.cmpi ne, %1, %c0_i32_0 : i32
    scf.if %2 {
      %cst_10 = arith.constant 0.000000e+00 : f32
      %12 = vector.broadcast %cst_10 : f32 to vector<32x64xf32>
      %c0_11 = arith.constant 0 : index
      %c0_12 = arith.constant 0 : index
      %13 = vector.load %arg7[%c0_11, %c0_12] : memref<32x64xf32, #tpu.memory_space<vmem>>, vector<32x64xf32>
      tpu.vector_store %arg7[%c0_11, %c0_12], %12 {strides = array<i32>} : memref<32x64xf32, #tpu.memory_space<vmem>>, vector<32x64xf32>,
    } else {
    }
    %c0 = arith.constant 0 : index
    %c0_1 = arith.constant 0 : index
    %3 = vector.load %arg7[%c0, %c0_1] : memref<32x64xf32, #tpu.memory_space<vmem>>, vector<32x64xf32>
    %c0_2 = arith.constant 0 : index
    %c0_3 = arith.constant 0 : index
    %4 = vector.load %arg3[%c0_2, %c0_3] : memref<32x32xbf16, #tpu.memory_space<vmem>>, vector<32x32xbf16>
    %c0_4 = arith.constant 0 : index
    %c0_5 = arith.constant 0 : index
    %5 = vector.load %arg4[%c0_4, %c0_5] : memref<32x64xbf16, #tpu.memory_space<vmem>>, vector<32x64xbf16>
    %cst = arith.constant dense<0.000000e+00> : vector<32x64xf32>
    %6 = tpu.matmul %4, %5, %cst {dimension_numbers = #tpu.dot_dimension_numbers<[1], [0], [0], [1], [0, 0, 1, 1], [], []>} : vector<32x32xbf16>, vector<32x64xbf16>, vector<32x64xf32> -> vector<32x64xf32>
    %7 = arith.addf %3, %6 : vector<32x64xf32>
    %c0_6 = arith.constant 0 : index
    %c0_7 = arith.constant 0 : index
    %8 = vector.load %arg7[%c0_6, %c0_7] : memref<32x64xf32, #tpu.memory_space<vmem>>, vector<32x64xf32>
    tpu.vector_store %arg7[%c0_6, %c0_7], %7 {strides = array<i32>} : memref<32x64xf32, #tpu.memory_space<vmem>>, vector<32x64xf32>,
    %c0_i32_8 = arith.constant 0 : i32
    %9 = arith.cmpi eq, %arg2, %c0_i32_8 : i32
    %10 = arith.extui %9 : i1 to i32
    %c0_i32_9 = arith.constant 0 : i32
    %11 = arith.cmpi ne, %10, %c0_i32_9 : i32
    scf.if %11 {
      %c0_10 = arith.constant 0 : index
      %c0_11 = arith.constant 0 : index
      %12 = vector.load %arg7[%c0_10, %c0_11] : memref<32x64xf32, #tpu.memory_space<vmem>>, vector<32x64xf32>
      %c0_12 = arith.constant 0 : index
      %c0_13 = arith.constant 0 : index
      %13 = vector.load %arg5[%c0_12, %c0_13] : memref<1x64xf32, #tpu.memory_space<vmem>>, vector<1x64xf32>
      %14 = vector.broadcast %13 : vector<1x64xf32> to vector<32x64xf32>
      %15 = arith.addf %12, %14 : vector<32x64xf32>
      %cst_14 = arith.constant 0.000000e+00 : f32
      %16 = vector.broadcast %cst_14 : f32 to vector<32x64xf32>
      %17 = arith.maximumf %15, %16 : vector<32x64xf32>
      %18 = arith.truncf %17 : vector<32x64xf32> to vector<32x64xbf16>
      %c0_15 = arith.constant 0 : index
      %c0_16 = arith.constant 0 : index
      %19 = vector.load %arg6[%c0_15, %c0_16] : memref<32x64xbf16, #tpu.memory_space<vmem>>, vector<32x64xbf16>
      tpu.vector_store %arg6[%c0_15, %c0_16], %18 {strides = array<i32>} : memref<32x64xbf16, #tpu.memory_space<vmem>>, vector<32x64xbf16>,
    } else {
    }
    return
  }
  func.func @transform_0(%arg0: i32, %arg1: i32, %arg2: i32) -> (i32, i32) {
    %c0_i32 = arith.constant 0 : i32
    return %arg0, %arg2 : i32, i32
  }
  func.func @transform_1(%arg0: i32, %arg1: i32, %arg2: i32) -> (i32, i32) {
    %c0_i32 = arith.constant 0 : i32
    return %arg2, %arg1 : i32, i32
  }
  func.func @transform_2(%arg0: i32, %arg1: i32, %arg2: i32) -> (i32, i32) {
    %c0_i32 = arith.constant 0 : i32
    %c0_i32_0 = arith.constant 0 : i32
    return %c0_i32, %arg1 : i32, i32
  }
  func.func @transform_3(%arg0: i32, %arg1: i32, %arg2: i32) -> (i32, i32) {
    %c0_i32 = arith.constant 0 : i32
    return %arg0, %arg1 : i32, i32
  }
}

module attributes {stable_mosaic.version = 11 : i64} {
  func.func @_matmul_res_ln_kernel(%arg0: i32, %arg1: i32, %arg2: memref<32x64xbf16, #tpu.memory_space<vmem>>, %arg3: memref<64x32xbf16, #tpu.memory_space<vmem>>, %arg4: memref<1x32xf32, #tpu.memory_space<vmem>>, %arg5: memref<32x32xbf16, #tpu.memory_space<vmem>>, %arg6: memref<1x32xf32, #tpu.memory_space<vmem>>, %arg7: memref<1x32xf32, #tpu.memory_space<vmem>>, %arg8: memref<32x32xf32, #tpu.memory_space<vmem>>, %arg9: memref<32x32xf32, #tpu.memory_space<vmem>>) attributes {dimension_semantics = [#tpu.dimension_semantics<parallel>, #tpu.dimension_semantics<arbitrary>], iteration_bounds = array<i64: 1, 1>, scalar_prefetch = 0 : i64, scratch_operands = 1 : i64, tpu.core_type = #tpu.core_type<tc>, window_params = [{transform_indices = @transform_0, window_bounds = array<i64: 32, 64>}, {transform_indices = @transform_1, window_bounds = array<i64: 64, 32>}, {pipeline_mode = #tpu.pipeline_mode<synchronous>, transform_indices = @transform_2, window_bounds = array<i64: 1, 32>}, {transform_indices = @transform_3, window_bounds = array<i64: 32, 32>}, {pipeline_mode = #tpu.pipeline_mode<synchronous>, transform_indices = @transform_4, window_bounds = array<i64: 1, 32>}, {pipeline_mode = #tpu.pipeline_mode<synchronous>, transform_indices = @transform_5, window_bounds = array<i64: 1, 32>}, {transform_indices = @transform_6, window_bounds = array<i64: 32, 32>}]} {
    %c0_i32 = arith.constant 0 : i32
    %0 = arith.cmpi eq, %arg1, %c0_i32 : i32
    %1 = arith.extui %0 : i1 to i32
    %c0_i32_0 = arith.constant 0 : i32
    %2 = arith.cmpi ne, %1, %c0_i32_0 : i32
    scf.if %2 {
      %cst_10 = arith.constant 0.000000e+00 : f32
      %12 = vector.broadcast %cst_10 : f32 to vector<32x32xf32>
      %c0_11 = arith.constant 0 : index
      %c0_12 = arith.constant 0 : index
      %13 = vector.load %arg9[%c0_11, %c0_12] : memref<32x32xf32, #tpu.memory_space<vmem>>, vector<32x32xf32>
      tpu.vector_store %arg9[%c0_11, %c0_12], %12 {strides = array<i32>} : memref<32x32xf32, #tpu.memory_space<vmem>>, vector<32x32xf32>,
    } else {
    }
    %c0 = arith.constant 0 : index
    %c0_1 = arith.constant 0 : index
    %3 = vector.load %arg9[%c0, %c0_1] : memref<32x32xf32, #tpu.memory_space<vmem>>, vector<32x32xf32>
    %c0_2 = arith.constant 0 : index
    %c0_3 = arith.constant 0 : index
    %4 = vector.load %arg2[%c0_2, %c0_3] : memref<32x64xbf16, #tpu.memory_space<vmem>>, vector<32x64xbf16>
    %c0_4 = arith.constant 0 : index
    %c0_5 = arith.constant 0 : index
    %5 = vector.load %arg3[%c0_4, %c0_5] : memref<64x32xbf16, #tpu.memory_space<vmem>>, vector<64x32xbf16>
    %cst = arith.constant dense<0.000000e+00> : vector<32x32xf32>
    %6 = tpu.matmul %4, %5, %cst {dimension_numbers = #tpu.dot_dimension_numbers<[1], [0], [0], [1], [0, 0, 1, 1], [], []>} : vector<32x64xbf16>, vector<64x32xbf16>, vector<32x32xf32> -> vector<32x32xf32>
    %7 = arith.addf %3, %6 : vector<32x32xf32>
    %c0_6 = arith.constant 0 : index
    %c0_7 = arith.constant 0 : index
    %8 = vector.load %arg9[%c0_6, %c0_7] : memref<32x32xf32, #tpu.memory_space<vmem>>, vector<32x32xf32>
    tpu.vector_store %arg9[%c0_6, %c0_7], %7 {strides = array<i32>} : memref<32x32xf32, #tpu.memory_space<vmem>>, vector<32x32xf32>,
    %c0_i32_8 = arith.constant 0 : i32
    %9 = arith.cmpi eq, %arg1, %c0_i32_8 : i32
    %10 = arith.extui %9 : i1 to i32
    %c0_i32_9 = arith.constant 0 : i32
    %11 = arith.cmpi ne, %10, %c0_i32_9 : i32
    scf.if %11 {
      %c0_10 = arith.constant 0 : index
      %c0_11 = arith.constant 0 : index
      %12 = vector.load %arg9[%c0_10, %c0_11] : memref<32x32xf32, #tpu.memory_space<vmem>>, vector<32x32xf32>
      %c0_12 = arith.constant 0 : index
      %c0_13 = arith.constant 0 : index
      %13 = vector.load %arg4[%c0_12, %c0_13] : memref<1x32xf32, #tpu.memory_space<vmem>>, vector<1x32xf32>
      %14 = vector.broadcast %13 : vector<1x32xf32> to vector<32x32xf32>
      %15 = arith.addf %12, %14 : vector<32x32xf32>
      %c0_14 = arith.constant 0 : index
      %c0_15 = arith.constant 0 : index
      %16 = vector.load %arg5[%c0_14, %c0_15] : memref<32x32xbf16, #tpu.memory_space<vmem>>, vector<32x32xbf16>
      %17 = arith.extf %16 : vector<32x32xbf16> to vector<32x32xf32>
      %18 = arith.addf %15, %17 : vector<32x32xf32>
      %cst_16 = arith.constant dense<0.000000e+00> : vector<32xf32>
      %19 = vector.multi_reduction <add>, %18, %cst_16 [1] : vector<32x32xf32> to vector<32xf32>
      %20 = vector.shape_cast %19 : vector<32xf32> to vector<32x1xf32>
      %cst_17 = arith.constant 3.200000e+01 : f32
      %21 = vector.broadcast %cst_17 : f32 to vector<32x1xf32>
      %22 = arith.divf %20, %21 : vector<32x1xf32>
      %23 = vector.broadcast %22 : vector<32x1xf32> to vector<32x32xf32>
      %24 = arith.subf %18, %23 : vector<32x32xf32>
      %25 = arith.mulf %24, %24 : vector<32x32xf32>
      %cst_18 = arith.constant dense<0.000000e+00> : vector<32xf32>
      %26 = vector.multi_reduction <add>, %25, %cst_18 [1] : vector<32x32xf32> to vector<32xf32>
      %27 = vector.shape_cast %26 : vector<32xf32> to vector<32x1xf32>
      %cst_19 = arith.constant 3.200000e+01 : f32
      %28 = vector.broadcast %cst_19 : f32 to vector<32x1xf32>
      %29 = arith.divf %27, %28 : vector<32x1xf32>
      %cst_20 = arith.constant 9.99999974E-6 : f32
      %30 = vector.broadcast %cst_20 : f32 to vector<32x1xf32>
      %31 = arith.addf %29, %30 : vector<32x1xf32>
      %32 = math.rsqrt %31 : vector<32x1xf32>
      %33 = vector.broadcast %32 : vector<32x1xf32> to vector<32x32xf32>
      %34 = arith.mulf %24, %33 : vector<32x32xf32>
      %c0_21 = arith.constant 0 : index
      %c0_22 = arith.constant 0 : index
      %35 = vector.load %arg6[%c0_21, %c0_22] : memref<1x32xf32, #tpu.memory_space<vmem>>, vector<1x32xf32>
      %36 = vector.broadcast %35 : vector<1x32xf32> to vector<32x32xf32>
      %37 = arith.mulf %34, %36 : vector<32x32xf32>
      %c0_23 = arith.constant 0 : index
      %c0_24 = arith.constant 0 : index
      %38 = vector.load %arg7[%c0_23, %c0_24] : memref<1x32xf32, #tpu.memory_space<vmem>>, vector<1x32xf32>
      %39 = vector.broadcast %38 : vector<1x32xf32> to vector<32x32xf32>
      %40 = arith.addf %37, %39 : vector<32x32xf32>
      %c0_25 = arith.constant 0 : index
      %c0_26 = arith.constant 0 : index
      %41 = vector.load %arg8[%c0_25, %c0_26] : memref<32x32xf32, #tpu.memory_space<vmem>>, vector<32x32xf32>
      tpu.vector_store %arg8[%c0_25, %c0_26], %40 {strides = array<i32>} : memref<32x32xf32, #tpu.memory_space<vmem>>, vector<32x32xf32>,
    } else {
    }
    return
  }
  func.func @transform_0(%arg0: i32, %arg1: i32) -> (i32, i32) {
    %c0_i32 = arith.constant 0 : i32
    return %arg0, %arg1 : i32, i32
  }
  func.func @transform_1(%arg0: i32, %arg1: i32) -> (i32, i32) {
    %c0_i32 = arith.constant 0 : i32
    %c0_i32_0 = arith.constant 0 : i32
    return %arg1, %c0_i32 : i32, i32
  }
  func.func @transform_2(%arg0: i32, %arg1: i32) -> (i32, i32) {
    %c0_i32 = arith.constant 0 : i32
    %c0_i32_0 = arith.constant 0 : i32
    %c0_i32_1 = arith.constant 0 : i32
    return %c0_i32, %c0_i32_0 : i32, i32
  }
  func.func @transform_3(%arg0: i32, %arg1: i32) -> (i32, i32) {
    %c0_i32 = arith.constant 0 : i32
    %c0_i32_0 = arith.constant 0 : i32
    return %arg0, %c0_i32 : i32, i32
  }
  func.func @transform_4(%arg0: i32, %arg1: i32) -> (i32, i32) {
    %c0_i32 = arith.constant 0 : i32
    %c0_i32_0 = arith.constant 0 : i32
    %c0_i32_1 = arith.constant 0 : i32
    return %c0_i32, %c0_i32_0 : i32, i32
  }
  func.func @transform_5(%arg0: i32, %arg1: i32) -> (i32, i32) {
    %c0_i32 = arith.constant 0 : i32
    %c0_i32_0 = arith.constant 0 : i32
    %c0_i32_1 = arith.constant 0 : i32
    return %c0_i32, %c0_i32_0 : i32, i32
  }
  func.func @transform_6(%arg0: i32, %arg1: i32) -> (i32, i32) {
    %c0_i32 = arith.constant 0 : i32
    %c0_i32_0 = arith.constant 0 : i32
    return %arg0, %c0_i32 : i32, i32
  }
}

</mosaic_0001>

<bundles_post_ra>
// kernel: transformer_seq_layer_forward.5
= control target key start
LH: loop header
LB: loop body
LE: loop exit
PB: predicated region body
PF: predicated region fallthrough
CT: control target
= control target key end

     0   :  { %vm19_vm0 = vcmask 261120   ;;  %v197_v1 = vmov 0.0   ;;  %vm156_vm1 = vcmask 257024   ;;  %s255_s1 = inlined_call_operand.vmem [shape: bf16[32,32], index: 1, kind: input, shape index: {}]   ;;  %s256_s0 = inlined_call_operand.vmem [shape: bf16[32,32], index: 0, kind: input, shape index: {}]   ;;  %s257_s2 = inlined_call_operand.vmem [shape: f32[1,32], index: 2, kind: input, shape index: {}]   ;;  %s258_s3 = inlined_call_operand.vmem [shape: bf16[32,32], index: 3, kind: output, shape index: {}]  }
   0x1   :  { %v193_v0 = vld [vmem:[%s255_s1 + $0x8] sm:$0xff]   ;;  %22 = vst.msk [vmem:[#allocation2 + $0x10] sm:$0xff] %vm19_vm0, %v197_v1  ;;  %20 = vst.msk [vmem:[#allocation2] sm:$0xff] %vm19_vm0, %v197_v1  ;;  %v194_v2 = vld [vmem:[%s255_s1] sm:$0xff]  }
   0x2   :  { %21 = vst.msk [vmem:[#allocation2 + $0x8] sm:$0xff] %vm19_vm0, %v197_v1  ;;  %23 = vst.msk [vmem:[#allocation2 + $0x18] sm:$0xff] %vm19_vm0, %v197_v1  ;;  %184 = vmatprep.subr.bf16.mxu0 %v193_v0  ;;  %v195_v3 = vld [vmem:[%s256_s0] sm:$0xff]   ;;  %v196_v4 = vld [vmem:[%s256_s0 + $0x8] sm:$0xff]  }
   0x3   :  { %185 = vmatpush3.bf16.msra.mxu0 %v193_v0  ;;  %188 = vmatprep.mubr.msk.bf16.mxu0 %vm19_vm0, %v195_v3  ;;  %v171_v17 = vld [vmem:[%s257_s2] ss:$0 sm:$0xff] }
   0x4   :  { %186 = vmatprep.subr.bf16.mxu0 %v194_v2 }
   0x7   :  { %187 = vmatpush3.bf16.msra.mxu0 %v194_v2 }
   0x8   :  { %v26_v5 = vld [vmem:[#allocation2 + $0x10] sm:$0xff]  ;;  %v24_v7 = vld [vmem:[#allocation2] sm:$0xff] }
   0x9   :  { %v27_v10 = vld [vmem:[#allocation2 + $0x18] sm:$0xff]  ;;  %v25_v13 = vld [vmem:[#allocation2 + $0x8] sm:$0xff] }
   0xa   :  { %189 = vmatmul.mubr.msk.bf16.vlgmr.msra.gmra.mxu0 %vm19_vm0, %v196_v4 }
  0xca   :  { %v190_v6 = vpop.f32.mrf.mxu0 }
  0xcb   :  { %v116_v8 = vadd.f32 %v190_v6, %v26_v5 }
  0xcc   :  { %v99_v9 = vpop.f32.mrf.mxu0 }
  0xcd   :  { %120 = vst.msk [vmem:[#allocation2 + $0x10] sm:$0xff] %vm19_vm0, %v116_v8  ;;  %v114_v11 = vadd.f32 %v99_v9, %v24_v7 }
  0xce   :  { %v191_v12 = vpop.f32.mrf.mxu0 }
  0xcf   :  { %118 = vst.msk [vmem:[#allocation2] sm:$0xff] %vm19_vm0, %v114_v11  ;;  %v117_v14 = vadd.f32 %v191_v12, %v27_v10 }
  0xd0   :  { %v102_v15 = vpop.f32.mrf.mxu0 }
  0xd1   :  { %121 = vst.msk [vmem:[#allocation2 + $0x18] sm:$0xff] %vm19_vm0, %v117_v14  ;;  %v115_v16 = vadd.f32 %v102_v15, %v25_v13 }
  0xd3   :  { %119 = vst.msk [vmem:[#allocation2 + $0x8] sm:$0xff] %vm19_vm0, %v115_v16 }
  0xd4   :  { %v127_v18 = vld [vmem:[#allocation2 + $0x10] sm:$0xff] }
  0xd5   :  { %v138_v19 = vadd.f32 %v171_v17, %v127_v18 }
  0xd6   :  { %v125_v20 = vld [vmem:[#allocation2] sm:$0xff] }
  0xd7   :  { %v178_v21 = vpack.c.bf16 %v138_v19, %v138_v19  ;;  %v136_v22 = vadd.f32 %v171_v17, %v125_v20 }
  0xd8   :  { %v128_v23 = vld [vmem:[#allocation2 + $0x18] sm:$0xff] }
  0xd9   :  { %159 = vst.msk [vmem:[%s258_s3 + $0x8] sm:$0xf] %vm156_vm1, %v178_v21  ;;  %v176_v24 = vpack.c.bf16 %v136_v22, %v136_v22  ;;  %v139_v25 = vadd.f32 %v171_v17, %v128_v23 }
  0xda   :  { %v126_v26 = vld [vmem:[#allocation2 + $0x8] sm:$0xff] }
  0xdb   :  { %157 = vst.msk [vmem:[%s258_s3] sm:$0xf] %vm156_vm1, %v176_v24  ;;  %v179_v27 = vpack.c.bf16 %v139_v25, %v139_v25  ;;  %v137_v28 = vadd.f32 %v171_v17, %v126_v26 }
  0xdd   :  { %160 = vst.msk [vmem:[%s258_s3 + $0xc] sm:$0xf] %vm156_vm1, %v179_v27  ;;  %v177_v29 = vpack.c.bf16 %v137_v28, %v137_v28 }
  0xdf   :  { %158 = vst.msk [vmem:[%s258_s3 + $0x4] sm:$0xf] %vm156_vm1, %v177_v29 }

// kernel: transformer_seq_layer_forward.6
= control target key start
LH: loop header
LB: loop body
LE: loop exit
PB: predicated region body
PF: predicated region fallthrough
CT: control target
= control target key end

     0   :  { %vm19_vm0 = vcmask 523264   ;;  %v302_v1 = vmov 0.0   ;;  %vm80_vm1 = vcmask 261120   ;;  %vm233_vm2 = vcmask 519168   ;;  %s392_s1 = inlined_call_operand.vmem [shape: bf16[32,64], index: 1, kind: input, shape index: {}]   ;;  %s393_s0 = inlined_call_operand.vmem [shape: bf16[64,32], index: 0, kind: input, shape index: {}]   ;;  %s394_s2 = inlined_call_operand.vmem [shape: f32[1,64], index: 2, kind: input, shape index: {}]   ;;  %s395_s3 = inlined_call_operand.vmem [shape: bf16[64,64], index: 3, kind: output, shape index: {}]  }
   0x1   :  { %v296_v0 = vld [vmem:[%s392_s1 + $0x8] sm:$0xff]   ;;  %22 = vst.msk [vmem:[#allocation2 + $0x10] sm:$0xff] %vm19_vm0, %v302_v1  ;;  %20 = vst.msk [vmem:[#allocation2] sm:$0xff] %vm19_vm0, %v302_v1  ;;  %v297_v2 = vld [vmem:[%s392_s1] sm:$0xff]  }
   0x2   :  { %21 = vst.msk [vmem:[#allocation2 + $0x8] sm:$0xff] %vm19_vm0, %v302_v1  ;;  %23 = vst.msk [vmem:[#allocation2 + $0x18] sm:$0xff] %vm19_vm0, %v302_v1  ;;  %279 = vmatprep.subr.bf16.mxu0 %v296_v0  ;;  %291 = vmatprep.subr.bf16.mxu1 %v296_v0  ;;  %v298_v3 = vld [vmem:[%s393_s0] sm:$0xff]   ;;  %v299_v4 = vld [vmem:[%s393_s0 + $0x10] sm:$0xff]  }
   0x3   :  { %24 = vst.msk [vmem:[#allocation2 + $0x20] sm:$0xff] %vm19_vm0, %v302_v1  ;;  %25 = vst.msk [vmem:[#allocation2 + $0x28] sm:$0xff] %vm19_vm0, %v302_v1  ;;  %280 = vmatpush3.bf16.msra.mxu0 %v296_v0  ;;  %293 = vmatpush3.bf16.msra.mxu1 %v296_v0  ;;  %v300_v5 = vld [vmem:[%s393_s0 + $0x8] sm:$0xff]   ;;  %v301_v6 = vld [vmem:[%s393_s0 + $0x18] sm:$0xff]  }
   0x4   :  { %26 = vst.msk [vmem:[#allocation2 + $0x30] sm:$0xff] %vm19_vm0, %v302_v1  ;;  %27 = vst.msk [vmem:[#allocation2 + $0x38] sm:$0xff] %vm19_vm0, %v302_v1  ;;  %281 = vmatprep.subr.bf16.mxu0 %v297_v2  ;;  %292 = vmatprep.subr.bf16.mxu1 %v297_v2  ;;  %v256_v31 = vld [vmem:[%s394_s2] ss:$0 sm:$0xff] }
   0x5   :  { %283 = vmatprep.mubr.msk.bf16.mxu0 %vm80_vm1, %v298_v3  ;;  %287 = vmatprep.mubr.msk.bf16.mxu1 %vm80_vm1, %v299_v4 }
   0x7   :  { %282 = vmatpush3.bf16.msra.mxu0 %v297_v2  ;;  %294 = vmatpush3.bf16.msra.mxu1 %v297_v2 }
   0x8   :  { %v30_v7 = vld [vmem:[#allocation2 + $0x10] sm:$0xff]  ;;  %v28_v11 = vld [vmem:[#allocation2] sm:$0xff] }
   0x9   :  { %v31_v17 = vld [vmem:[#allocation2 + $0x18] sm:$0xff]  ;;  %v29_v23 = vld [vmem:[#allocation2 + $0x8] sm:$0xff] }
   0xa   :  { %284 = vmatmul.mubr.msk.bf16.vlgmr.msra.gmra.mxu0 %vm80_vm1, %v300_v5  ;;  %288 = vmatmul.mubr.msk.bf16.vlgmr.msra.gmra.mxu1 %vm80_vm1, %v301_v6  ;;  %v32_v12 = vld [vmem:[#allocation2 + $0x20] sm:$0xff]  ;;  %v33_v24 = vld [vmem:[#allocation2 + $0x28] sm:$0xff] }
   0xb   :  { %v34_v8 = vld [vmem:[#allocation2 + $0x30] sm:$0xff]  ;;  %v35_v18 = vld [vmem:[#allocation2 + $0x38] sm:$0xff] }
  0xca   :  { %v285_v9 = vpop.f32.mrf.mxu0  ;;  %v289_v10 = vpop.f32.mrf.mxu1 }
  0xcb   :  { %v160_v13 = vadd.f32 %v285_v9, %v30_v7  ;;  %v164_v14 = vadd.f32 %v289_v10, %v34_v8 }
  0xcc   :  { %v127_v15 = vpop.f32.mrf.mxu0  ;;  %v143_v16 = vpop.f32.mrf.mxu1 }
  0xcd   :  { %169 = vst.msk [vmem:[#allocation2 + $0x10] sm:$0xff] %vm19_vm0, %v160_v13  ;;  %173 = vst.msk [vmem:[#allocation2 + $0x30] sm:$0xff] %vm19_vm0, %v164_v14  ;;  %v158_v19 = vadd.f32 %v127_v15, %v28_v11  ;;  %v162_v20 = vadd.f32 %v143_v16, %v32_v12 }
  0xce   :  { %v286_v21 = vpop.f32.mrf.mxu0  ;;  %v290_v22 = vpop.f32.mrf.mxu1 }
  0xcf   :  { %167 = vst.msk [vmem:[#allocation2] sm:$0xff] %vm19_vm0, %v158_v19  ;;  %171 = vst.msk [vmem:[#allocation2 + $0x20] sm:$0xff] %vm19_vm0, %v162_v20  ;;  %v161_v25 = vadd.f32 %v286_v21, %v31_v17  ;;  %v165_v26 = vadd.f32 %v290_v22, %v35_v18 }
  0xd0   :  { %v130_v27 = vpop.f32.mrf.mxu0  ;;  %v146_v28 = vpop.f32.mrf.mxu1 }
  0xd1   :  { %170 = vst.msk [vmem:[#allocation2 + $0x18] sm:$0xff] %vm19_vm0, %v161_v25  ;;  %174 = vst.msk [vmem:[#allocation2 + $0x38] sm:$0xff] %vm19_vm0, %v165_v26  ;;  %v159_v29 = vadd.f32 %v130_v27, %v29_v23  ;;  %v163_v30 = vadd.f32 %v146_v28, %v33_v24 }
  0xd3   :  { %168 = vst.msk [vmem:[#allocation2 + $0x8] sm:$0xff] %vm19_vm0, %v159_v29  ;;  %172 = vst.msk [vmem:[#allocation2 + $0x28] sm:$0xff] %vm19_vm0, %v163_v30 }
  0xd4   :  { %v180_v32 = vld [vmem:[#allocation2 + $0x10] sm:$0xff] }
  0xd5   :  { %v184_v33 = vld [vmem:[#allocation2 + $0x30] sm:$0xff]  ;;  %v195_v34 = vadd.f32 %v256_v31, %v180_v32 }
  0xd6   :  { %v199_v35 = vadd.f32 %v256_v31, %v184_v33  ;;  %v178_v36 = vld [vmem:[#allocation2] sm:$0xff] }
  0xd7   :  { %v182_v37 = vld [vmem:[#allocation2 + $0x20] sm:$0xff]  ;;  %v267_v38 = vpack.c.bf16 %v195_v34, %v195_v34  ;;  %v193_v40 = vadd.f32 %v256_v31, %v178_v36 }
  0xd8   :  { %v271_v39 = vpack.c.bf16 %v199_v35, %v199_v35  ;;  %v197_v41 = vadd.f32 %v256_v31, %v182_v37  ;;  %v181_v42 = vld [vmem:[#allocation2 + $0x18] sm:$0xff] }
  0xd9   :  { %v185_v43 = vld [vmem:[#allocation2 + $0x38] sm:$0xff]  ;;  %236 = vst.msk [vmem:[%s395_s3 + $0x8] sm:$0xf] %vm233_vm2, %v267_v38  ;;  %v265_v44 = vpack.c.bf16 %v193_v40, %v193_v40  ;;  %v196_v46 = vadd.f32 %v256_v31, %v181_v42 }
  0xda   :  { %240 = vst.msk [vmem:[%s395_s3 + $0x18] sm:$0xf] %vm233_vm2, %v271_v39  ;;  %v269_v45 = vpack.c.bf16 %v197_v41, %v197_v41  ;;  %v200_v47 = vadd.f32 %v256_v31, %v185_v43  ;;  %v179_v48 = vld [vmem:[#allocation2 + $0x8] sm:$0xff] }
  0xdb   :  { %v183_v49 = vld [vmem:[#allocation2 + $0x28] sm:$0xff]  ;;  %234 = vst.msk [vmem:[%s395_s3] sm:$0xf] %vm233_vm2, %v265_v44  ;;  %v268_v50 = vpack.c.bf16 %v196_v46, %v196_v46  ;;  %v194_v52 = vadd.f32 %v256_v31, %v179_v48 }
  0xdc   :  { %238 = vst.msk [vmem:[%s395_s3 + $0x10] sm:$0xf] %vm233_vm2, %v269_v45  ;;  %v272_v51 = vpack.c.bf16 %v200_v47, %v200_v47  ;;  %v198_v53 = vadd.f32 %v256_v31, %v183_v49 }
  0xdd   :  { %237 = vst.msk [vmem:[%s395_s3 + $0xc] sm:$0xf] %vm233_vm2, %v268_v50  ;;  %v266_v54 = vpack.c.bf16 %v194_v52, %v194_v52 }
  0xde   :  { %241 = vst.msk [vmem:[%s395_s3 + $0x1c] sm:$0xf] %vm233_vm2, %v272_v51  ;;  %v270_v55 = vpack.c.bf16 %v198_v53, %v198_v53 }
  0xdf   :  { %235 = vst.msk [vmem:[%s395_s3 + $0x4] sm:$0xf] %vm233_vm2, %v266_v54 }
  0xe0   :  { %239 = vst.msk [vmem:[%s395_s3 + $0x14] sm:$0xf] %vm233_vm2, %v270_v55 }

// kernel: transformer_seq_layer_forward.8
= control target key start
LH: loop header
LB: loop body
LE: loop exit
PB: predicated region body
PF: predicated region fallthrough
CT: control target
= control target key end

     0   :  { %vm19_vm0 = vcmask 523264   ;;  %v202_v1 = vmov 0.0   ;;  %vm58_vm1 = vcmask 261120   ;;  %vm161_vm2 = vcmask 519168   ;;  %s258_s1 = inlined_call_operand.vmem [shape: bf16[32,64], index: 1, kind: input, shape index: {}]   ;;  %s259_s0 = inlined_call_operand.vmem [shape: bf16[32,32], index: 0, kind: input, shape index: {}]   ;;  %s260_s2 = inlined_call_operand.vmem [shape: f32[1,64], index: 2, kind: input, shape index: {}]   ;;  %s261_s3 = inlined_call_operand.vmem [shape: bf16[32,64], index: 3, kind: output, shape index: {}]  }
   0x1   :  { %v198_v0 = vld [vmem:[%s258_s1 + $0x8] sm:$0xff]   ;;  %22 = vst.msk [vmem:[#allocation2 + $0x10] sm:$0xff] %vm19_vm0, %v202_v1  ;;  %20 = vst.msk [vmem:[#allocation2] sm:$0xff] %vm19_vm0, %v202_v1  ;;  %v199_v2 = vld [vmem:[%s258_s1] sm:$0xff]  }
   0x2   :  { %21 = vst.msk [vmem:[#allocation2 + $0x8] sm:$0xff] %vm19_vm0, %v202_v1  ;;  %23 = vst.msk [vmem:[#allocation2 + $0x18] sm:$0xff] %vm19_vm0, %v202_v1  ;;  %189 = vmatprep.subr.bf16.mxu0 %v198_v0  ;;  %v200_v3 = vld [vmem:[%s259_s0] sm:$0xff]   ;;  %v201_v4 = vld [vmem:[%s259_s0 + $0x8] sm:$0xff]  }
   0x3   :  { %190 = vmatpush3.bf16.msra.mxu0 %v198_v0  ;;  %193 = vmatprep.mubr.msk.bf16.mxu0 %vm58_vm1, %v200_v3  ;;  %v176_v17 = vld [vmem:[%s260_s2] ss:$0 sm:$0xff] }
   0x4   :  { %191 = vmatprep.subr.bf16.mxu0 %v199_v2 }
   0x7   :  { %192 = vmatpush3.bf16.msra.mxu0 %v199_v2 }
   0x8   :  { %v26_v5 = vld [vmem:[#allocation2 + $0x10] sm:$0xff]  ;;  %v24_v7 = vld [vmem:[#allocation2] sm:$0xff] }
   0x9   :  { %v27_v10 = vld [vmem:[#allocation2 + $0x18] sm:$0xff]  ;;  %v25_v13 = vld [vmem:[#allocation2 + $0x8] sm:$0xff] }
   0xa   :  { %194 = vmatmul.mubr.msk.bf16.vlgmr.msra.gmra.mxu0 %vm58_vm1, %v201_v4 }
  0xca   :  { %v195_v6 = vpop.f32.mrf.mxu0 }
  0xcb   :  { %v116_v8 = vadd.f32 %v195_v6, %v26_v5 }
  0xcc   :  { %v99_v9 = vpop.f32.mrf.mxu0 }
  0xcd   :  { %121 = vst.msk [vmem:[#allocation2 + $0x10] sm:$0xff] %vm19_vm0, %v116_v8  ;;  %v114_v11 = vadd.f32 %v99_v9, %v24_v7 }
  0xce   :  { %v196_v12 = vpop.f32.mrf.mxu0 }
  0xcf   :  { %119 = vst.msk [vmem:[#allocation2] sm:$0xff] %vm19_vm0, %v114_v11  ;;  %v117_v14 = vadd.f32 %v196_v12, %v27_v10 }
  0xd0   :  { %v102_v15 = vpop.f32.mrf.mxu0 }
  0xd1   :  { %122 = vst.msk [vmem:[#allocation2 + $0x18] sm:$0xff] %vm19_vm0, %v117_v14  ;;  %v115_v16 = vadd.f32 %v102_v15, %v25_v13 }
  0xd3   :  { %120 = vst.msk [vmem:[#allocation2 + $0x8] sm:$0xff] %vm19_vm0, %v115_v16 }
  0xd4   :  { %v128_v18 = vld [vmem:[#allocation2 + $0x10] sm:$0xff] }
  0xd5   :  { %v139_v19 = vadd.f32 %v176_v17, %v128_v18 }
  0xd6   :  { %v126_v20 = vld [vmem:[#allocation2] sm:$0xff] }
  0xd7   :  { %v143_v21 = vmax.f32 %v139_v19, 0.0  ;;  %v137_v22 = vadd.f32 %v176_v17, %v126_v20 }
  0xd8   :  { %v129_v23 = vld [vmem:[#allocation2 + $0x18] sm:$0xff] }
  0xd9   :  { %v183_v24 = vpack.c.bf16 %v143_v21, %v143_v21  ;;  %v141_v25 = vmax.f32 %v137_v22, 0.0  ;;  %v140_v26 = vadd.f32 %v176_v17, %v129_v23 }
  0xda   :  { %v127_v27 = vld [vmem:[#allocation2 + $0x8] sm:$0xff] }
  0xdb   :  { %164 = vst.msk [vmem:[%s261_s3 + $0x8] sm:$0xf] %vm161_vm2, %v183_v24  ;;  %v181_v28 = vpack.c.bf16 %v141_v25, %v141_v25  ;;  %v144_v29 = vmax.f32 %v140_v26, 0.0  ;;  %v138_v30 = vadd.f32 %v176_v17, %v127_v27 }
  0xdd   :  { %162 = vst.msk [vmem:[%s261_s3] sm:$0xf] %vm161_vm2, %v181_v28  ;;  %v184_v31 = vpack.c.bf16 %v144_v29, %v144_v29  ;;  %v142_v32 = vmax.f32 %v138_v30, 0.0 }
  0xdf   :  { %165 = vst.msk [vmem:[%s261_s3 + $0xc] sm:$0xf] %vm161_vm2, %v184_v31  ;;  %v182_v33 = vpack.c.bf16 %v142_v32, %v142_v32 }
  0xe1   :  { %163 = vst.msk [vmem:[%s261_s3 + $0x4] sm:$0xf] %vm161_vm2, %v182_v33 }

// kernel: transformer_seq_layer_forward.7
= control target key start
LH: loop header
LB: loop body
LE: loop exit
PB: predicated region body
PF: predicated region fallthrough
CT: control target
= control target key end

     0   :  { %s2177_s27 = smov 0   ;;  %s2179_s28 = smov 0   ;;  %s2587_s0 = inlined_call_operand.vmem [shape: bf16[2,16,32], index: 0, kind: input, shape index: {}]   ;;  %s2588_s1 = inlined_call_operand.vmem [shape: bf16[2,32,64], index: 1, kind: input, shape index: {}, may-alias: {1,2}]   ;;  %s2589_s2 = inlined_call_operand.vmem [shape: bf16[2,32,64], index: 2, kind: input, shape index: {}, may-alias: {1,2}]   ;;  %s2590_s3 = inlined_call_operand.vmem [shape: bf16[8,16], index: 3, kind: input, shape index: {}]   ;;  %s2591_s4 = inlined_call_operand.vmem [shape: bf16[32,32], index: 4, kind: input, shape index: {}]   ;;  %s2592_s5 = inlined_call_operand.vmem [shape: bf16[2,16,32], index: 5, kind: input, shape index: {}]   ;;  %s2593_s6 = inlined_call_operand.vmem [shape: f32[1,32], index: 6, kind: input, shape index: {}]   ;;  %s2594_s7 = inlined_call_operand.vmem [shape: f32[1,32], index: 7, kind: input, shape index: {}]   ;;  %s2595_s8 = inlined_call_operand.vmem [shape: bf16[2,16,32], index: 8, kind: output, shape index: {}]  }
   0x1   :  { %s2181_s29 = smov 0  }
   0x2 LB: > { %s30_s30 = sadd.s32 1, %s2108_s28  ;;  %p1813_p0 = scmp.ge.s32.totalorder %s2112_s29, 1  ;;  %s2112_s29 = sphi %s2181_s29, %s18_s29   ;;  %s2108_s28 = sphi %s2179_s28, %s2634_s28   ;;  %s2104_s27 = sphi %s2177_s27, %s2633_s27  }
   0x3   : > { %p32_p1 = scmp.ge.s32.totalorder %s30_s30, 2  ;;  %p338_p2 = scmp.lt.s32.totalorder %s2112_s29, 3 }
   0x5   : > { %s2636_s30 = smov (%p32_p1, %s30_s30), 0  ;;  %p339_p3 = pnand %p1813_p0, %p338_p2 }
   0x6   : > { %p409_p4 = scmp.lt.s32.totalorder (!%p339_p3), %s2104_s27, 1  ;;  %s2116_s23 = smov (!%p339_p3), 97  }
   0x7   : > { %342 = sbr.rel (%p339_p3) target bundleno = 4802 (0x12c2), region = 52  ;;  %s2117_s24 = smov (!%p339_p3), 1  }
   0x8   : > { %s2118_s25 = smov (!%p339_p3), 2   ;;  %s2119_s26 = smov (!%p339_p3), 98  }
   0x9   : > { %s2121_s9 = smov (!%p339_p3), 100   ;;  %s2122_s10 = smov (!%p339_p3), 8  }
   0xa   : > { %s2124_s13 = smov (!%p339_p3), 96   ;;  %s2125_s14 = smov (!%p339_p3), 120  }
   0xb   : > { %s2127_s16 = smov (!%p339_p3), 112   ;;  %s2128_s17 = smov (!%p339_p3), 80  }
   0xc   : > { %v477_v0 = vld [vmem:[%s2590_s3] sm:$0xf]  ;;  %vm532_vm0 = vcmask 1043456   ;;  %v2114_v1 = vmov 0.0   ;;  %vm2115_vm1 = vmmov 0   ;;  %s2638_s27 = smov (!%p409_p4, %s2104_s27), 1  ;;  %v478_v14 = vlaneseq }
   0xd   : > { %1896 = vmatprep.subr.bf16.mxu0 %v2114_v1  ;;  %v2199_v2 = vsel %vm532_vm0, %v477_v0, 0  ;;  %1898 = vmatprep.mubr.msk.bf16.mxu0 %vm2115_vm1, %v2114_v1  ;;  %s2208_s11 = sshll.u32 %s2638_s27, 3  ;;  %s1849_s12 = sshll.u32 %s2638_s27, 4  ;;  %vm528_vm2 = vcmask 64512   ;;  %vm577_vm3 = vcmask 130048   ;;  %vm2598_vm5 = vcmask 7168  }
   0xe   : > { %1897 = vmatpush3.bf16.msra.mxu0 %v2199_v2  ;;  %1902 = vmatprep.subr.bf16.mxu1 %v2114_v1  ;;  %s416_s15 = scalar_lea.vmem %s2587_s0, %s2208_s11  ;;  %s426_s18 = scalar_lea.vmem %s2588_s1, %s1849_s12  ;;  %v479_v15 = vshrl.u32 %v478_v14, 7  ;;  %vm2597_vm7 = vcmask 15360   ;;  %vm2596_vm10 = vcmask 31744   ;;  %v482_v52 = vand.u32 127, %v478_v14 }
   0xf   : > { %1906 = vmatprep.mubr.msk.bf16.mxu1 %vm2115_vm1, %v2114_v1  ;;  %1910 = vmatprep.subr.bf16.mxu0 %v2114_v1  ;;  %s1851_s19 = sadd.s32 8, %s1849_s12  ;;  %v2220_v3 = vld [vmem:[%s416_s15] sm:$0xff]   ;;  %s2120_s27 = smov 4   ;;  %vm704_vm0 = vcmask 261120  }
  0x10   : > { %s437_s22 = scalar_lea.vmem %s2589_s2, %s1851_s19  ;;  %v2232_v10 = vld [vmem:[%s426_s18] sm:$0xff]   ;;  %v2246_v16 = vadd.s32 8, %v479_v15  ;;  %v491_v21 = vand.u32 1, %v479_v15  ;;  %v499_v33 = vand.u32 2, %v479_v15  ;;  %s2123_s12 = smov 104   ;;  %v507_v51 = vand.u32 4, %v479_v15 }
  0x11   : > { %1899 = vmatmul.mubr.msk.bf16.vlgmr.msra.gmra.mxu0 %vm528_vm2, %v2220_v3  ;;  %v2226_v4 = vld [vmem:[%s437_s22] sm:$0xff]   ;;  %v656_v13 = vsel %vm528_vm2, %v2232_v10, 0  ;;  %v483_v57 = vsub.s32 %v482_v52, %v479_v15  ;;  %s2126_s15 = smov 88   ;;  %s2129_s18 = smov 72  }
  0x12   : > { %1914 = vmatprep.mubr.msk.bf16.mxu0 %vm2115_vm1, %v2114_v1  ;;  %v659_v8 = vsel %vm528_vm2, %v2226_v4, 0  ;;  %v492_v18 = vand.u32 1, %v2246_v16  ;;  %vm2259_vm6 = vcmp.ne.s32.totalorder %v491_v21, 0  ;;  %v500_v29 = vand.u32 2, %v2246_v16  ;;  %s2130_s19 = smov 16  }
  0x13   : > { %1903 = vmatpush3.bf16.xpose.msra.mxu1 %v659_v8  ;;  %vm2277_vm9 = vcmp.ne.s32.totalorder %v499_v33, 0  ;;  %v508_v45 = vand.u32 4, %v2246_v16  ;;  %vm2297_vm12 = vcmp.ne.s32.totalorder %v507_v51, 0  ;;  %vm485_vm13 = vcmp.ge.s32.totalorder %v483_v57, 0 }
  0x14   : > { %1904 = vmatprep.subr.bf16.mxu1 %v2114_v1  ;;  %vm2249_vm4 = vcmp.ne.s32.totalorder %v492_v18, 0  ;;  %vm2268_vm8 = vcmp.ne.s32.totalorder %v500_v29, 0  ;;  %vm487_vm14 = vcmp.lt.s32.totalorder %v483_v57, 16  ;;  %v484_v63 = vsub.s32 %v482_v52, %v2246_v16 }
  0x15   : > { %vm2287_vm11 = vcmp.ne.s32.totalorder %v508_v45, 0  ;;  %vm2303_vm15 = vmand %vm485_vm13, %vm487_vm14  ;;  %vm2617_vm13 = vcmask 15360  }
  0x16   : > { %vm2618_vm14 = vmmov %vm2617_vm13 }
  0x1b   : > { %1905 = vmatpush3.bf16.xpose.msra.mxu1 %v656_v13 }
  0x1c   : > { %1924 = vmatprep.subr.bf16.mxu1 %v2114_v1 }
  0x22   : > { %1907 = vmatmul.mubr.msk.bf16.vlgmr.msra.gmra.mxu1 %vm528_vm2, %v2220_v3 }
  0x23   : > { %1928 = vmatprep.mubr.msk.bf16.mxu1 %vm2115_vm1, %v2114_v1 }
  0xd1   : > { %v570_v5 = vpop.f32.mrf.mxu0 }
  0xd2   : > { %v578_v6 = vsel %vm577_vm3, %v570_v5, 0.0 }
  0xd3   : > { %582 = vrot.lane.b32.xlu1 %v578_v6, %s2116_s23  ;;  %v1900_v7 = vpop.f32.mrf.mxu0 }
  0xd5   : > { %v573_v9 = vpop.f32.mrf.mxu0 }
  0xd6   : > { %v579_v11 = vsel %vm577_vm3, %v573_v9, 0.0 }
  0xd7   : > { %588 = vrot.lane.b32.xlu1 %v578_v6, %s2117_s24  ;;  %584 = vrot.lane.b32.xlu0 %v579_v11, %s2116_s23  ;;  %v1901_v12 = vpop.f32.mrf.mxu0 }
  0xdb   : > { %590 = vrot.lane.b32.xlu0 %v579_v11, %s2117_s24 }
  0xe2   : > { %v695_v30 = vpop.f32.mrf.mxu1 }
  0xe4   : > { %v1908_v31 = vpop.f32.mrf.mxu1 }
  0xe6   : > { %v698_v43 = vpop.f32.mrf.mxu1 }
  0xe8   : > { %v1909_v44 = vpop.f32.mrf.mxu1 }
 0x145   : > { %v583_v17 = vpop.permute.xlu1 %582 }
 0x149   : > { %v585_v19 = vpop.permute.xlu0 %584  ;;  %v589_v22 = vpop.permute.xlu1 %588 }
 0x14a   : > { %v595_v26 = vsel %vm2598_vm5, %v583_v17, %v589_v22 }
 0x14b   : > { %v597_v28 = vsel %vm2259_vm6, %v595_v26, %v578_v6 }
 0x14d   : > { %v591_v23 = vpop.permute.xlu0 %590 }
 0x14e   : > { %v596_v24 = vsel %vm2598_vm5, %v585_v19, %v591_v23 }
 0x14f   : > { %v598_v25 = vsel %vm2249_vm4, %v596_v24, %v579_v11 }
 0x150   : > { %609 = vrot.lane.b32.xlu1 %v598_v25, %s2118_s25  ;;  %603 = vrot.lane.b32.xlu0 %v598_v25, %s2119_s26 }
 0x154   : > { %607 = vrot.lane.b32.xlu1 %v597_v28, %s2118_s25  ;;  %601 = vrot.lane.b32.xlu0 %v597_v28, %s2119_s26 }
 0x1c2   : > { %v610_v34 = vpop.permute.xlu1 %609  ;;  %v604_v35 = vpop.permute.xlu0 %603 }
 0x1c3   : > { %v615_v36 = vsel %vm2597_vm7, %v604_v35, %v610_v34 }
 0x1c4   : > { %v617_v37 = vsel %vm2268_vm8, %v615_v36, %v598_v25 }
 0x1c5   : > { %628 = vrot.lane.b32.xlu1 %v617_v37, %s2120_s27  ;;  %622 = vrot.lane.b32.xlu0 %v617_v37, %s2121_s9 }
 0x1c6   : > { %v608_v39 = vpop.permute.xlu1 %607  ;;  %v602_v40 = vpop.permute.xlu0 %601 }
 0x1c7   : > { %v614_v41 = vsel %vm2597_vm7, %v602_v40, %v608_v39  ;;  %vm488_vm7 = vcmp.lt.s32.totalorder %v484_v63, 16 }
 0x1c8   : > { %v616_v42 = vsel %vm2277_vm9, %v614_v41, %v597_v28 }
 0x1c9   : > { %626 = vrot.lane.b32.xlu1 %v616_v42, %s2120_s27  ;;  %620 = vrot.lane.b32.xlu0 %v616_v42, %s2121_s9 }
 0x237   : > { %v629_v47 = vpop.permute.xlu1 %628  ;;  %v623_v48 = vpop.permute.xlu0 %622 }
 0x238   : > { %v634_v49 = vsel %vm2596_vm10, %v623_v48, %v629_v47 }
 0x239   : > { %v636_v50 = vsel %vm2287_vm11, %v634_v49, %v617_v37 }
 0x23a   : > { %647 = vrot.lane.b32.xlu1 %v636_v50, %s2122_s10  ;;  %641 = vrot.lane.b32.xlu0 %v636_v50, %s2123_s12 }
 0x23b   : > { %v627_v53 = vpop.permute.xlu1 %626  ;;  %v621_v54 = vpop.permute.xlu0 %620 }
 0x23c   : > { %v633_v55 = vsel %vm2596_vm10, %v621_v54, %v627_v53  ;;  %vm486_vm10 = vcmp.ge.s32.totalorder %v484_v63, 0 }
 0x23d   : > { %v635_v58 = vsel %vm2297_vm12, %v633_v55, %v616_v42  ;;  %vm2312_vm5 = vmand %vm486_vm10, %vm488_vm7  ;;  %vm2615_vm7 = vcmask 7168  }
 0x23e   : > { %v696_v59 = vadd.f32 %v695_v30, %v635_v58  ;;  %vm2616_vm10 = vmmov %vm2615_vm7 }
 0x240   : > { %v702_v61 = vsel %vm2303_vm15, %v696_v59, -1e+30 }
 0x241   : > { %v705_v62 = vsel %vm704_vm0, %v702_v61, -inf }
 0x259   : > { %706 = vmax.xlane.f32.xlu0 %v705_v62 }
 0x2ac   : > { %v648_v0 = vpop.permute.xlu1 %647  ;;  %v642_v5 = vpop.permute.xlu0 %641 }
 0x2ad   : > { %v652_v6 = vsel %vm528_vm2, %v642_v5, %v648_v0 }
 0x2ae   : > { %v699_v8 = vadd.f32 %v698_v43, %v652_v6 }
 0x2b0   : > { %v703_v9 = vsel %vm2312_vm5, %v699_v8, -1e+30 }
 0x2b1   : > { %v708_v11 = vsel %vm704_vm0, %v703_v9, -inf }
 0x2b2   : > { %709 = vmax.xlane.f32.xlu1 %v708_v11 }
 0x2c3   : > { %730 = vrot.lane.b32.xlu1 %v2226_v4, %s2124_s13 }
 0x2c7   : > { %778 = vrot.lane.b32.xlu1 %v2220_v3, %s2125_s14 }
 0x2cb   : > { %900 = vrot.lane.b32.xlu1 %v2226_v4, %s2125_s14 }
 0x2e2   : > { %v707_v12 = vpop.xlane.xlu0 %706 }
 0x2e3   : > { %v711_v13 = vsub.f32 %v702_v61, %v707_v12 }
 0x2e5   : > { %v713_v14 = vmul.f32 1.442695, %v711_v13 }
 0x2e7   : > { %2054 = vpow2.f32 %v713_v14 }
 0x2f4   : > { %v2055_v15 = vpop.eup %2054 }
 0x2f5   : > { %v717_v16 = vsel %vm704_vm0, %v2055_v15, 0.0 }
 0x2f6   : > { %718 = vadd.xlane.f32.xlu0 %v717_v16 }
 0x33b   : > { %v710_v17 = vpop.xlane.xlu1 %709 }
 0x33c   : > { %v712_v18 = vsub.f32 %v703_v9, %v710_v17 }
 0x33e   : > { %v715_v19 = vmul.f32 1.442695, %v712_v18 }
 0x33f   : > { %v731_v21 = vpop.permute.xlu1 %730 }
 0x340   : > { %2056 = vpow2.f32 %v715_v19  ;;  %1911 = vmatpush3.bf16.msra.mxu0 %v731_v21 }
 0x341   : > { %1912 = vmatprep.subr.bf16.mxu0 %v2114_v1 }
 0x343   : > { %v779_v24 = vpop.permute.xlu1 %778 }
 0x347   : > { %v901_v25 = vpop.permute.xlu1 %900 }
 0x348   : > { %v906_v26 = vsel %vm528_vm2, %v901_v25, 0 }
 0x349   : > { %1925 = vmatpush3.bf16.xpose.msra.mxu1 %v906_v26 }
 0x34a   : > { %1926 = vmatprep.subr.bf16.mxu1 %v2114_v1 }
 0x34d   : > { %v2057_v22 = vpop.eup %2056 }
 0x34e   : > { %v720_v23 = vsel %vm704_vm0, %v2057_v22, 0.0 }
 0x34f   : > { %721 = vadd.xlane.f32.xlu0 %v720_v23 }
 0x365   : > { %728 = vrot.lane.b32.xlu0 %v2232_v10, %s2124_s13 }
 0x369   : > { %898 = vrot.lane.b32.xlu0 %v2232_v10, %s2125_s14 }
 0x37f   : > { %v719_v28 = vpop.xlane.xlu0 %718 }
 0x380   : > { %2058 = vrcp.f32 %v719_v28 }
 0x38d   : > { %v2059_v34 = vpop.eup %2058 }
 0x38e   : > { %v725_v36 = vmul.f32 %v2059_v34, %v2055_v15 }
 0x3d8   : > { %v722_v29 = vpop.xlane.xlu0 %721 }
 0x3d9   : > { %2060 = vrcp.f32 %v722_v29 }
 0x3dc   : > { %v729_v30 = vpop.permute.xlu0 %728 }
 0x3dd   : > { %1913 = vmatpush3.bf16.msra.mxu0 %v729_v30 }
 0x3de   : > { %1918 = vmatprep.subr.bf16.mxu0 %v2114_v1 }
 0x3e0   : > { %v899_v31 = vpop.permute.xlu0 %898 }
 0x3e1   : > { %v903_v33 = vsel %vm528_vm2, %v899_v31, 0 }
 0x3e2   : > { %1927 = vmatpush3.bf16.xpose.msra.mxu1 %v903_v33 }
 0x3e3   : > { %1946 = vmatprep.subr.bf16.mxu1 %v2114_v1 }
 0x3e6   : > { %v2061_v35 = vpop.eup %2060 }
 0x3e7   : > { %v726_v37 = vmul.f32 %v2061_v35, %v2057_v22 }
 0x3e9   : > { %v727_v39 = vpack.c.bf16 %v726_v37, %v725_v36  ;;  %1929 = vmatmul.mubr.msk.bf16.vlgmr.msra.gmra.mxu1 %vm528_vm2, %v779_v24 }
 0x3ea   : > { %1950 = vmatprep.mubr.msk.bf16.mxu1 %vm2115_vm1, %v2114_v1 }
 0x3eb   : > { %1915 = vmatmul.mubr.msk.bf16.vlgmr.msra.gmra.mxu0 %vm704_vm0, %v727_v39 }
 0x3ec   : > { %1919 = vmatpush3.bf16.msra.mxu0 %v2199_v2  ;;  %1920 = vmatprep.mubr.msk.bf16.mxu0 %vm2115_vm1, %v2114_v1 }
 0x3ed   : > { %1932 = vmatprep.subr.bf16.mxu0 %v2114_v1 }
 0x3f3   : > { %1921 = vmatmul.mubr.msk.bf16.vlgmr.msra.gmra.mxu0 %vm528_vm2, %v779_v24 }
 0x3f4   : > { %1936 = vmatprep.mubr.msk.bf16.mxu0 %vm2115_vm1, %v2114_v1 }
 0x4a9   : > { %v942_v40 = vpop.f32.mrf.mxu1 }
 0x4ab   : > { %v2343_v41 = vpop.f32.mrf.mxu0  ;;  %v1930_v42 = vpop.f32.mrf.mxu1 }
 0x4ad   : > { %v1916_v43 = vpop.f32.mrf.mxu0  ;;  %v945_v44 = vpop.f32.mrf.mxu1 }
 0x4af   : > { %v2345_v45 = vpop.f32.mrf.mxu0  ;;  %v1931_v47 = vpop.f32.mrf.mxu1 }
 0x4b1   : > { %v1917_v48 = vpop.f32.mrf.mxu0 }
 0x4b3   : > { %v817_v49 = vpop.f32.mrf.mxu0 }
 0x4b4   : > { %v824_v54 = vsel %vm577_vm3, %v817_v49, 0.0 }
 0x4b5   : > { %v1922_v50 = vpop.f32.mrf.mxu0 }
 0x4b7   : > { %v820_v51 = vpop.f32.mrf.mxu0 }
 0x4b8   : > { %v825_v52 = vsel %vm577_vm3, %v820_v51, 0.0 }
 0x4b9   : > { %836 = vrot.lane.b32.xlu0 %v825_v52, %s2117_s24  ;;  %830 = vrot.lane.b32.xlu1 %v825_v52, %s2116_s23  ;;  %v1923_v53 = vpop.f32.mrf.mxu0 }
 0x4bd   : > { %834 = vrot.lane.b32.xlu0 %v824_v54, %s2117_s24  ;;  %828 = vrot.lane.b32.xlu1 %v824_v54, %s2116_s23 }
 0x52b   : > { %v837_v55 = vpop.permute.xlu0 %836  ;;  %v831_v57 = vpop.permute.xlu1 %830 }
 0x52c   : > { %v841_v58 = vsel %vm2615_vm7, %v831_v57, %v837_v55  ;;  %vm2619_vm7 = vcmask 31744  }
 0x52d   : > { %v843_v59 = vsel %vm2249_vm4, %v841_v58, %v825_v52 }
 0x52e   : > { %854 = vrot.lane.b32.xlu0 %v843_v59, %s2118_s25  ;;  %848 = vrot.lane.b32.xlu1 %v843_v59, %s2119_s26 }
 0x52f   : > { %v835_v61 = vpop.permute.xlu0 %834  ;;  %v829_v62 = vpop.permute.xlu1 %828 }
 0x530   : > { %v840_v63 = vsel %vm2616_vm10, %v829_v62, %v835_v61  ;;  %vm2620_vm10 = vmmov %vm2619_vm7 }
 0x531   : > { %v842_v0 = vsel %vm2259_vm6, %v840_v63, %v824_v54 }
 0x532   : > { %852 = vrot.lane.b32.xlu0 %v842_v0, %s2118_s25  ;;  %846 = vrot.lane.b32.xlu1 %v842_v0, %s2119_s26 }
 0x5a0   : > { %v855_v5 = vpop.permute.xlu0 %854  ;;  %v849_v6 = vpop.permute.xlu1 %848 }
 0x5a1   : > { %v859_v8 = vsel %vm2617_vm13, %v849_v6, %v855_v5  ;;  %vm2621_vm13 = vcmask 7168  }
 0x5a2   : > { %v861_v9 = vsel %vm2268_vm8, %v859_v8, %v843_v59 }
 0x5a3   : > { %872 = vrot.lane.b32.xlu0 %v861_v9, %s2120_s27  ;;  %866 = vrot.lane.b32.xlu1 %v861_v9, %s2121_s9 }
 0x5a4   : > { %v853_v11 = vpop.permute.xlu0 %852  ;;  %v847_v12 = vpop.permute.xlu1 %846 }
 0x5a5   : > { %v858_v13 = vsel %vm2618_vm14, %v847_v12, %v853_v11  ;;  %vm2622_vm14 = vmmov %vm2621_vm13 }
 0x5a6   : > { %v860_v14 = vsel %vm2277_vm9, %v858_v13, %v842_v0 }
 0x5a7   : > { %870 = vrot.lane.b32.xlu0 %v860_v14, %s2120_s27  ;;  %864 = vrot.lane.b32.xlu1 %v860_v14, %s2121_s9 }
 0x615   : > { %v873_v15 = vpop.permute.xlu0 %872  ;;  %v867_v16 = vpop.permute.xlu1 %866 }
 0x616   : > { %v877_v17 = vsel %vm2619_vm7, %v867_v16, %v873_v15  ;;  %vm2623_vm7 = vcmask 15360  }
 0x617   : > { %v879_v18 = vsel %vm2287_vm11, %v877_v17, %v861_v9 }
 0x618   : > { %890 = vrot.lane.b32.xlu0 %v879_v18, %s2122_s10  ;;  %884 = vrot.lane.b32.xlu1 %v879_v18, %s2123_s12 }
 0x619   : > { %v871_v19 = vpop.permute.xlu0 %870  ;;  %v865_v21 = vpop.permute.xlu1 %864 }
 0x61a   : > { %v876_v22 = vsel %vm2620_vm10, %v865_v21, %v871_v19  ;;  %vm2624_vm10 = vmmov %vm2623_vm7 }
 0x61b   : > { %v878_v23 = vsel %vm2297_vm12, %v876_v22, %v860_v14 }
 0x61c   : > { %v943_v24 = vadd.f32 %v942_v40, %v878_v23 }
 0x61e   : > { %v949_v25 = vsel %vm2303_vm15, %v943_v24, -1e+30 }
 0x61f   : > { %v951_v26 = vsel %vm704_vm0, %v949_v25, -inf }
 0x63c   : > { %952 = vmax.xlane.f32.xlu1 %v951_v26 }
 0x68a   : > { %v891_v28 = vpop.permute.xlu0 %890  ;;  %v885_v29 = vpop.permute.xlu1 %884 }
 0x68b   : > { %v895_v30 = vsel %vm528_vm2, %v885_v29, %v891_v28 }
 0x68c   : > { %v946_v31 = vadd.f32 %v945_v44, %v895_v30 }
 0x68e   : > { %v950_v33 = vsel %vm2312_vm5, %v946_v31, -1e+30 }
 0x68f   : > { %v954_v34 = vsel %vm704_vm0, %v950_v33, -inf }
 0x690   : > { %955 = vmax.xlane.f32.xlu0 %v954_v34 }
 0x6c5   : > { %v953_v35 = vpop.xlane.xlu1 %952 }
 0x6c6   : > { %v957_v36 = vsub.f32 %v949_v25, %v953_v35 }
 0x6c8   : > { %v959_v37 = vmul.f32 1.442695, %v957_v36 }
 0x6ca   : > { %2062 = vpow2.f32 %v959_v37 }
 0x6d7   : > { %v2063_v39 = vpop.eup %2062 }
 0x6d8   : > { %v963_v40 = vsel %vm704_vm0, %v2063_v39, 0.0 }
 0x6d9   : > { %964 = vadd.xlane.f32.xlu0 %v963_v40 }
 0x6ef   : > { %976 = vrot.lane.b32.xlu0 %v2226_v4, %s2126_s15 }
 0x6f3   : > { %1146 = vrot.lane.b32.xlu0 %v2226_v4, %s2127_s16 }
 0x719   : > { %v956_v42 = vpop.xlane.xlu0 %955 }
 0x71a   : > { %v958_v43 = vsub.f32 %v950_v33, %v956_v42 }
 0x71c   : > { %v961_v44 = vmul.f32 1.442695, %v958_v43 }
 0x71e   : > { %2064 = vpow2.f32 %v961_v44 }
 0x72b   : > { %v2065_v47 = vpop.eup %2064 }
 0x72c   : > { %v966_v48 = vsel %vm704_vm0, %v2065_v47, 0.0 }
 0x72d   : > { %967 = vadd.xlane.f32.xlu1 %v966_v48 }
 0x73e   : > { %974 = vrot.lane.b32.xlu1 %v2232_v10, %s2126_s15 }
 0x742   : > { %1024 = vrot.lane.b32.xlu1 %v2220_v3, %s2127_s16 }
 0x746   : > { %1144 = vrot.lane.b32.xlu1 %v2232_v10, %s2127_s16  ;;  %s458_s16 = scalar_lea.vmem %s2595_s8, %s2208_s11 }
 0x762   : > { %v965_v49 = vpop.xlane.xlu0 %964 }
 0x763   : > { %2066 = vrcp.f32 %v965_v49 }
 0x766   : > { %v977_v50 = vpop.permute.xlu0 %976 }
 0x767   : > { %1933 = vmatpush3.bf16.msra.mxu0 %v977_v50 }
 0x768   : > { %1934 = vmatprep.subr.bf16.mxu0 %v2114_v1 }
 0x76a   : > { %v1147_v51 = vpop.permute.xlu0 %1146 }
 0x76b   : > { %v1152_v52 = vsel %vm528_vm2, %v1147_v51, 0 }
 0x76c   : > { %1947 = vmatpush3.bf16.xpose.msra.mxu1 %v1152_v52 }
 0x76d   : > { %1948 = vmatprep.subr.bf16.mxu1 %v2114_v1 }
 0x770   : > { %v2067_v57 = vpop.eup %2066 }
 0x771   : > { %v971_v62 = vmul.f32 %v2067_v57, %v2063_v39 }
 0x7b6   : > { %v968_v53 = vpop.xlane.xlu1 %967 }
 0x7b7   : > { %2068 = vrcp.f32 %v968_v53 }
 0x7ba   : > { %v975_v54 = vpop.permute.xlu1 %974 }
 0x7bb   : > { %1935 = vmatpush3.bf16.msra.mxu0 %v975_v54 }
 0x7bc   : > { %1940 = vmatprep.subr.bf16.mxu0 %v2114_v1 }
 0x7be   : > { %v1025_v55 = vpop.permute.xlu1 %1024 }
 0x7c2   : > { %v1145_v58 = vpop.permute.xlu1 %1144 }
 0x7c3   : > { %v1149_v59 = vsel %vm528_vm2, %v1145_v58, 0 }
 0x7c4   : > { %v2069_v61 = vpop.eup %2068  ;;  %1949 = vmatpush3.bf16.xpose.msra.mxu1 %v1149_v59 }
 0x7c5   : > { %v972_v63 = vmul.f32 %v2069_v61, %v2065_v47  ;;  %1968 = vmatprep.subr.bf16.mxu1 %v2114_v1 }
 0x7c7   : > { %v973_v0 = vpack.c.bf16 %v972_v63, %v971_v62 }
 0x7c9   : > { %1937 = vmatmul.mubr.msk.bf16.vlgmr.msra.gmra.mxu0 %vm704_vm0, %v973_v0 }
 0x7ca   : > { %1941 = vmatpush3.bf16.msra.mxu0 %v2199_v2  ;;  %1942 = vmatprep.mubr.msk.bf16.mxu0 %vm2115_vm1, %v2114_v1 }
 0x7cb   : > { %1951 = vmatmul.mubr.msk.bf16.vlgmr.msra.gmra.mxu1 %vm528_vm2, %v1025_v55  ;;  %1954 = vmatprep.subr.bf16.mxu0 %v2114_v1 }
 0x7cc   : > { %1972 = vmatprep.mubr.msk.bf16.mxu1 %vm2115_vm1, %v2114_v1 }
 0x7d1   : > { %1943 = vmatmul.mubr.msk.bf16.vlgmr.msra.gmra.mxu0 %vm528_vm2, %v1025_v55 }
 0x7d2   : > { %1958 = vmatprep.mubr.msk.bf16.mxu0 %vm2115_vm1, %v2114_v1 }
 0x889   : > { %v2412_v5 = vpop.f32.mrf.mxu0 }
 0x88b   : > { %v1938_v6 = vpop.f32.mrf.mxu0  ;;  %v1188_v8 = vpop.f32.mrf.mxu1 }
 0x88d   : > { %v2414_v9 = vpop.f32.mrf.mxu0  ;;  %v1952_v11 = vpop.f32.mrf.mxu1 }
 0x88e   : > { %v2034_v12 = vpack.i.bf16 %v2414_v9, %v2412_v5  ;;  %v2052_v5 = vld [vmem:[%s2591_s4 + $0x8] sm:$0xff]   ;;  %v2053_v9 = vld [vmem:[%s2591_s4] sm:$0xff]  }
 0x88f   : > { %v1939_v13 = vpop.f32.mrf.mxu0  ;;  %v1191_v14 = vpop.f32.mrf.mxu1 }
 0x891   : > { %v1063_v15 = vpop.f32.mrf.mxu0  ;;  %v1953_v16 = vpop.f32.mrf.mxu1 }
 0x892   : > { %v1070_v22 = vsel %vm577_vm3, %v1063_v15, 0.0 }
 0x893   : > { %v1944_v17 = vpop.f32.mrf.mxu0 }
 0x895   : > { %v1066_v18 = vpop.f32.mrf.mxu0 }
 0x896   : > { %v1071_v19 = vsel %vm577_vm3, %v1066_v18, 0.0 }
 0x897   : > { %1082 = vrot.lane.b32.xlu1 %v1071_v19, %s2117_s24  ;;  %1076 = vrot.lane.b32.xlu0 %v1071_v19, %s2116_s23  ;;  %v1945_v21 = vpop.f32.mrf.mxu0 }
 0x89b   : > { %1080 = vrot.lane.b32.xlu1 %v1070_v22, %s2117_s24  ;;  %1074 = vrot.lane.b32.xlu0 %v1070_v22, %s2116_s23 }
 0x909   : > { %v1083_v23 = vpop.permute.xlu1 %1082  ;;  %v1077_v24 = vpop.permute.xlu0 %1076 }
 0x90a   : > { %v1087_v25 = vsel %vm2621_vm13, %v1077_v24, %v1083_v23  ;;  %vm2625_vm13 = vcmask 31744  }
 0x90b   : > { %v1089_v26 = vsel %vm2249_vm4, %v1087_v25, %v1071_v19 }
 0x90c   : > { %1100 = vrot.lane.b32.xlu1 %v1089_v26, %s2118_s25  ;;  %1094 = vrot.lane.b32.xlu0 %v1089_v26, %s2119_s26 }
 0x90d   : > { %v1081_v28 = vpop.permute.xlu1 %1080  ;;  %v1075_v29 = vpop.permute.xlu0 %1074 }
 0x90e   : > { %v1086_v30 = vsel %vm2622_vm14, %v1075_v29, %v1081_v28  ;;  %vm2626_vm14 = vmmov %vm2625_vm13 }
 0x90f   : > { %v1088_v31 = vsel %vm2259_vm6, %v1086_v30, %v1070_v22 }
 0x910   : > { %1098 = vrot.lane.b32.xlu1 %v1088_v31, %s2118_s25  ;;  %1092 = vrot.lane.b32.xlu0 %v1088_v31, %s2119_s26 }
 0x97e   : > { %v1101_v33 = vpop.permute.xlu1 %1100  ;;  %v1095_v34 = vpop.permute.xlu0 %1094 }
 0x97f   : > { %v1105_v35 = vsel %vm2623_vm7, %v1095_v34, %v1101_v33  ;;  %vm2627_vm7 = vcmask 7168  }
 0x980   : > { %v1107_v36 = vsel %vm2268_vm8, %v1105_v35, %v1089_v26 }
 0x981   : > { %1118 = vrot.lane.b32.xlu1 %v1107_v36, %s2120_s27  ;;  %1112 = vrot.lane.b32.xlu0 %v1107_v36, %s2121_s9 }
 0x982   : > { %v1099_v37 = vpop.permute.xlu1 %1098  ;;  %v1093_v39 = vpop.permute.xlu0 %1092 }
 0x983   : > { %v1104_v40 = vsel %vm2624_vm10, %v1093_v39, %v1099_v37  ;;  %vm2628_vm10 = vmmov %vm2627_vm7 }
 0x984   : > { %v1106_v42 = vsel %vm2277_vm9, %v1104_v40, %v1088_v31 }
 0x985   : > { %1116 = vrot.lane.b32.xlu1 %v1106_v42, %s2120_s27  ;;  %1110 = vrot.lane.b32.xlu0 %v1106_v42, %s2121_s9 }
 0x9f3   : > { %v1119_v43 = vpop.permute.xlu1 %1118  ;;  %v1113_v44 = vpop.permute.xlu0 %1112 }
 0x9f4   : > { %v1123_v47 = vsel %vm2625_vm13, %v1113_v44, %v1119_v43  ;;  %vm2629_vm13 = vcmask 15360  }
 0x9f5   : > { %v1125_v48 = vsel %vm2287_vm11, %v1123_v47, %v1107_v36 }
 0x9f6   : > { %1136 = vrot.lane.b32.xlu1 %v1125_v48, %s2122_s10  ;;  %1130 = vrot.lane.b32.xlu0 %v1125_v48, %s2123_s12 }
 0x9f7   : > { %v1117_v49 = vpop.permute.xlu1 %1116  ;;  %v1111_v50 = vpop.permute.xlu0 %1110 }
 0x9f8   : > { %v1122_v51 = vsel %vm2626_vm14, %v1111_v50, %v1117_v49 }
 0x9f9   : > { %v1124_v52 = vsel %vm2297_vm12, %v1122_v51, %v1106_v42 }
 0x9fa   : > { %v1189_v53 = vadd.f32 %v1188_v8, %v1124_v52 }
 0x9fc   : > { %v1195_v54 = vsel %vm2303_vm15, %v1189_v53, -1e+30 }
 0x9fd   : > { %v1197_v55 = vsel %vm704_vm0, %v1195_v54, -inf }
 0xa15   : > { %1198 = vmax.xlane.f32.xlu0 %v1197_v55 }
 0xa68   : > { %v1137_v57 = vpop.permute.xlu1 %1136  ;;  %v1131_v58 = vpop.permute.xlu0 %1130 }
 0xa69   : > { %v1141_v59 = vsel %vm528_vm2, %v1131_v58, %v1137_v57 }
 0xa6a   : > { %v1192_v61 = vadd.f32 %v1191_v14, %v1141_v59 }
 0xa6c   : > { %v1196_v62 = vsel %vm2312_vm5, %v1192_v61, -1e+30 }
 0xa6d   : > { %v1200_v63 = vsel %vm704_vm0, %v1196_v62, -inf }
 0xa6e   : > { %1201 = vmax.xlane.f32.xlu1 %v1200_v63 }
 0xa7f   : > { %1222 = vrot.lane.b32.xlu1 %v2226_v4, %s2128_s17 }
 0xa83   : > { %1270 = vrot.lane.b32.xlu1 %v2220_v3, %s2123_s12 }
 0xa87   : > { %1392 = vrot.lane.b32.xlu1 %v2226_v4, %s2123_s12 }
 0xa9e   : > { %v1199_v0 = vpop.xlane.xlu0 %1198 }
 0xa9f   : > { %v1203_v6 = vsub.f32 %v1195_v54, %v1199_v0 }
 0xaa1   : > { %v1205_v8 = vmul.f32 1.442695, %v1203_v6 }
 0xaa3   : > { %2070 = vpow2.f32 %v1205_v8 }
 0xab0   : > { %v2071_v11 = vpop.eup %2070 }
 0xab1   : > { %v1209_v13 = vsel %vm704_vm0, %v2071_v11, 0.0 }
 0xab2   : > { %1210 = vadd.xlane.f32.xlu0 %v1209_v13 }
 0xaf7   : > { %v1202_v14 = vpop.xlane.xlu1 %1201 }
 0xaf8   : > { %v1204_v15 = vsub.f32 %v1196_v62, %v1202_v14 }
 0xafa   : > { %v1207_v16 = vmul.f32 1.442695, %v1204_v15 }
 0xafb   : > { %v1223_v17 = vpop.permute.xlu1 %1222 }
 0xafc   : > { %2072 = vpow2.f32 %v1207_v16  ;;  %1955 = vmatpush3.bf16.msra.mxu0 %v1223_v17 }
 0xafd   : > { %1956 = vmatprep.subr.bf16.mxu0 %v2114_v1 }
 0xaff   : > { %v1271_v19 = vpop.permute.xlu1 %1270 }
 0xb03   : > { %v1393_v21 = vpop.permute.xlu1 %1392 }
 0xb04   : > { %v1398_v22 = vsel %vm528_vm2, %v1393_v21, 0 }
 0xb05   : > { %1969 = vmatpush3.bf16.xpose.msra.mxu1 %v1398_v22 }
 0xb06   : > { %1970 = vmatprep.subr.bf16.mxu1 %v2114_v1 }
 0xb09   : > { %v2073_v3 = vpop.eup %2072 }
 0xb0a   : > { %v1212_v18 = vsel %vm704_vm0, %v2073_v3, 0.0 }
 0xb0b   : > { %1213 = vadd.xlane.f32.xlu0 %v1212_v18 }
 0xb21   : > { %1220 = vrot.lane.b32.xlu0 %v2232_v10, %s2128_s17 }
 0xb25   : > { %1390 = vrot.lane.b32.xlu0 %v2232_v10, %s2123_s12 }
 0xb3b   : > { %v1211_v23 = vpop.xlane.xlu0 %1210 }
 0xb3c   : > { %2074 = vrcp.f32 %v1211_v23 }
 0xb49   : > { %v2075_v29 = vpop.eup %2074 }
 0xb4a   : > { %v1217_v31 = vmul.f32 %v2075_v29, %v2071_v11 }
 0xb94   : > { %v1214_v24 = vpop.xlane.xlu0 %1213 }
 0xb95   : > { %2076 = vrcp.f32 %v1214_v24 }
 0xb98   : > { %v1221_v25 = vpop.permute.xlu0 %1220 }
 0xb99   : > { %1957 = vmatpush3.bf16.msra.mxu0 %v1221_v25 }
 0xb9a   : > { %1962 = vmatprep.subr.bf16.mxu0 %v2114_v1 }
 0xb9c   : > { %v1391_v26 = vpop.permute.xlu0 %1390 }
 0xb9d   : > { %v1395_v28 = vsel %vm528_vm2, %v1391_v26, 0 }
 0xb9e   : > { %1971 = vmatpush3.bf16.xpose.msra.mxu1 %v1395_v28 }
 0xba2   : > { %v2077_v30 = vpop.eup %2076 }
 0xba3   : > { %v1218_v33 = vmul.f32 %v2077_v30, %v2073_v3 }
 0xba5   : > { %v1219_v34 = vpack.c.bf16 %v1218_v33, %v1217_v31  ;;  %1973 = vmatmul.mubr.msk.bf16.vlgmr.msra.gmra.mxu1 %vm528_vm2, %v1271_v19 }
 0xba7   : > { %1959 = vmatmul.mubr.msk.bf16.vlgmr.msra.gmra.mxu0 %vm704_vm0, %v1219_v34 }
 0xba8   : > { %1963 = vmatpush3.bf16.msra.mxu0 %v2199_v2  ;;  %1964 = vmatprep.mubr.msk.bf16.mxu0 %vm2115_vm1, %v2114_v1 }
 0xba9   : > { %1976 = vmatprep.subr.bf16.mxu0 %v2114_v1 }
 0xbaf   : > { %1965 = vmatmul.mubr.msk.bf16.vlgmr.msra.gmra.mxu0 %vm528_vm2, %v1271_v19 }
 0xbb0   : > { %1980 = vmatprep.mubr.msk.bf16.mxu0 %vm2115_vm1, %v2114_v1 }
 0xc65   : > { %v1434_v35 = vpop.f32.mrf.mxu1 }
 0xc67   : > { %v2483_v36 = vpop.f32.mrf.mxu0  ;;  %v1974_v37 = vpop.f32.mrf.mxu1 }
 0xc69   : > { %v1960_v39 = vpop.f32.mrf.mxu0  ;;  %v1437_v40 = vpop.f32.mrf.mxu1 }
 0xc6b   : > { %v2485_v42 = vpop.f32.mrf.mxu0  ;;  %v1975_v43 = vpop.f32.mrf.mxu1 }
 0xc6c   : > { %v2039_v2 = vpack.i.bf16 %v2485_v42, %v2483_v36 }
 0xc6d   : > { %v1961_v44 = vpop.f32.mrf.mxu0 }
 0xc6f   : > { %v1309_v47 = vpop.f32.mrf.mxu0 }
 0xc70   : > { %v1316_v52 = vsel %vm577_vm3, %v1309_v47, 0.0 }
 0xc71   : > { %v1966_v48 = vpop.f32.mrf.mxu0 }
 0xc73   : > { %v1312_v49 = vpop.f32.mrf.mxu0 }
 0xc74   : > { %v1317_v50 = vsel %vm577_vm3, %v1312_v49, 0.0 }
 0xc75   : > { %1328 = vrot.lane.b32.xlu0 %v1317_v50, %s2117_s24  ;;  %1322 = vrot.lane.b32.xlu1 %v1317_v50, %s2116_s23  ;;  %v1967_v51 = vpop.f32.mrf.mxu0 }
 0xc79   : > { %1326 = vrot.lane.b32.xlu0 %v1316_v52, %s2117_s24  ;;  %1320 = vrot.lane.b32.xlu1 %v1316_v52, %s2116_s23  ;;  %s2131_s24 = smov 24  }
 0xce7   : > { %v1329_v53 = vpop.permute.xlu0 %1328  ;;  %v1323_v54 = vpop.permute.xlu1 %1322 }
 0xce8   : > { %v1333_v55 = vsel %vm2627_vm7, %v1323_v54, %v1329_v53 }
 0xce9   : > { %v1335_v57 = vsel %vm2249_vm4, %v1333_v55, %v1317_v50  ;;  %vm2630_vm4 = vmmov %vm2629_vm13 }
 0xcea   : > { %1346 = vrot.lane.b32.xlu0 %v1335_v57, %s2118_s25  ;;  %1340 = vrot.lane.b32.xlu1 %v1335_v57, %s2119_s26 }
 0xceb   : > { %v1327_v58 = vpop.permute.xlu0 %1326  ;;  %v1321_v59 = vpop.permute.xlu1 %1320 }
 0xcec   : > { %v1332_v61 = vsel %vm2628_vm10, %v1321_v59, %v1327_v58 }
 0xced   : > { %v1334_v62 = vsel %vm2259_vm6, %v1332_v61, %v1316_v52  ;;  %vm2631_vm6 = vmmov %vm2626_vm14 }
 0xcee   : > { %1344 = vrot.lane.b32.xlu0 %v1334_v62, %s2118_s25  ;;  %1338 = vrot.lane.b32.xlu1 %v1334_v62, %s2119_s26 }
 0xd5c   : > { %v1347_v63 = vpop.permute.xlu0 %1346  ;;  %v1341_v0 = vpop.permute.xlu1 %1340 }
 0xd5d   : > { %v1351_v20 = vsel %vm2629_vm13, %v1341_v0, %v1347_v63 }
 0xd5e   : > { %v1353_v6 = vsel %vm2268_vm8, %v1351_v20, %v1335_v57  ;;  %vm2632_vm8 = vmmov %vm2631_vm6 }
 0xd5f   : > { %1364 = vrot.lane.b32.xlu0 %v1353_v6, %s2120_s27  ;;  %1358 = vrot.lane.b32.xlu1 %v1353_v6, %s2121_s9 }
 0xd60   : > { %v1345_v8 = vpop.permute.xlu0 %1344  ;;  %v1339_v11 = vpop.permute.xlu1 %1338 }
 0xd61   : > { %v1350_v27 = vsel %vm2630_vm4, %v1339_v11, %v1345_v8 }
 0xd62   : > { %v1352_v13 = vsel %vm2277_vm9, %v1350_v27, %v1334_v62 }
 0xd63   : > { %1362 = vrot.lane.b32.xlu0 %v1352_v13, %s2120_s27  ;;  %1356 = vrot.lane.b32.xlu1 %v1352_v13, %s2121_s9  ;;  %s448_s27 = scalar_lea.vmem %s2592_s5, %s2208_s11 }
 0xdd1   : > { %v1365_v14 = vpop.permute.xlu0 %1364  ;;  %v1359_v15 = vpop.permute.xlu1 %1358 }
 0xdd2   : > { %v1369_v32 = vsel %vm2631_vm6, %v1359_v15, %v1365_v14 }
 0xdd3   : > { %v1371_v16 = vsel %vm2287_vm11, %v1369_v32, %v1353_v6 }
 0xdd4   : > { %1382 = vrot.lane.b32.xlu0 %v1371_v16, %s2122_s10  ;;  %1376 = vrot.lane.b32.xlu1 %v1371_v16, %s2123_s12 }
 0xdd5   : > { %v1363_v17 = vpop.permute.xlu0 %1362  ;;  %v1357_v3 = vpop.permute.xlu1 %1356 }
 0xdd6   : > { %v1368_v38 = vsel %vm2632_vm8, %v1357_v3, %v1363_v17 }
 0xdd7   : > { %v1370_v18 = vsel %vm2297_vm12, %v1368_v38, %v1352_v13 }
 0xdd8   : > { %v1435_v19 = vadd.f32 %v1434_v35, %v1370_v18 }
 0xdda   : > { %v1441_v21 = vsel %vm2303_vm15, %v1435_v19, -1e+30 }
 0xddb   : > { %v1443_v22 = vsel %vm704_vm0, %v1441_v21, -inf }
 0xdf8   : > { %1444 = vmax.xlane.f32.xlu1 %v1443_v22 }
 0xe46   : > { %v1383_v46 = vpop.permute.xlu0 %1382  ;;  %v1377_v23 = vpop.permute.xlu1 %1376 }
 0xe47   : > { %v1387_v24 = vsel %vm528_vm2, %v1377_v23, %v1383_v46 }
 0xe48   : > { %v1438_v25 = vadd.f32 %v1437_v40, %v1387_v24 }
 0xe4a   : > { %v1442_v26 = vsel %vm2312_vm5, %v1438_v25, -1e+30 }
 0xe4b   : > { %v1446_v28 = vsel %vm704_vm0, %v1442_v26, -inf }
 0xe4c   : > { %1447 = vmax.xlane.f32.xlu0 %v1446_v28 }
 0xe81   : > { %v1445_v56 = vpop.xlane.xlu1 %1444 }
 0xe82   : > { %v1449_v29 = vsub.f32 %v1441_v21, %v1445_v56 }
 0xe84   : > { %v1451_v30 = vmul.f32 1.442695, %v1449_v29 }
 0xe86   : > { %2078 = vpow2.f32 %v1451_v30 }
 0xe93   : > { %v2079_v60 = vpop.eup %2078 }
 0xe94   : > { %v1455_v31 = vsel %vm704_vm0, %v2079_v60, 0.0 }
 0xe95   : > { %1456 = vadd.xlane.f32.xlu0 %v1455_v31 }
 0xeab   : > { %1468 = vrot.lane.b32.xlu0 %v2226_v4, %s2129_s18 }
 0xeaf   : > { %2040 = vrot.lane.b32.xlu0 %v2039_v2, %s2130_s19 }
 0xed5   : > { %v1448_v7 = vpop.xlane.xlu0 %1447 }
 0xed6   : > { %v1450_v33 = vsub.f32 %v1442_v26, %v1448_v7 }
 0xed8   : > { %v1453_v34 = vmul.f32 1.442695, %v1450_v33  ;;  %v1842_v33 = vld [vmem:[%s2593_s6] ss:$0 sm:$0xff] }
 0xeda   : > { %2080 = vpow2.f32 %v1453_v34 }
 0xee7   : > { %v2081_v35 = vpop.eup %2080 }
 0xee8   : > { %v1458_v37 = vsel %vm704_vm0, %v2081_v35, 0.0 }
 0xee9   : > { %1459 = vadd.xlane.f32.xlu1 %v1458_v37 }
 0xefa   : > { %1466 = vrot.lane.b32.xlu1 %v2232_v10, %s2129_s18 }
 0xefe   : > { %2035 = vrot.lane.b32.xlu1 %v2034_v12, %s2122_s10 }
 0xf1e   : > { %v1457_v4 = vpop.xlane.xlu0 %1456 }
 0xf1f   : > { %2082 = vrcp.f32 %v1457_v4 }
 0xf22   : > { %v1469_v39 = vpop.permute.xlu0 %1468 }
 0xf23   : > { %1977 = vmatpush3.bf16.msra.mxu0 %v1469_v39 }
 0xf24   : > { %1978 = vmatprep.subr.bf16.mxu0 %v2114_v1 }
 0xf26   : > { %v2041_v54 = vpop.permute.xlu0 %2040 }
 0xf27   : > { %v2043_v57 = vunpack.i.h.bf16 %v2041_v54  ;;  %v2042_v58 = vunpack.i.l.bf16 %v2041_v54 }
 0xf2c   : > { %v2083_v42 = vpop.eup %2082 }
 0xf2d   : > { %v1463_v10 = vmul.f32 %v2083_v42, %v2079_v60 }
 0xf72   : > { %v1460_v36 = vpop.xlane.xlu1 %1459 }
 0xf73   : > { %2084 = vrcp.f32 %v1460_v36 }
 0xf76   : > { %v1467_v40 = vpop.permute.xlu1 %1466 }
 0xf77   : > { %1979 = vmatpush3.bf16.msra.mxu0 %v1467_v40 }
 0xf78   : > { %1984 = vmatprep.subr.bf16.mxu0 %v2114_v1 }
 0xf7a   : > { %v2036_v51 = vpop.permute.xlu1 %2035 }
 0xf7b   : > { %v2038_v52 = vunpack.i.h.bf16 %v2036_v51  ;;  %v2037_v53 = vunpack.i.l.bf16 %v2036_v51 }
 0xf7d   : > { %v1540_v55 = vsel %vm528_vm2, %v2343_v41, %v2037_v53  ;;  %v1857_v41 = vld [vmem:[%s448_s27] sm:$0xff]  }
 0xf7e   : > { %v1542_v63 = vsel %vm577_vm3, %v1540_v55, %v2042_v58  ;;  %v1859_v13 = vunpack.c.h.bf16 %v1857_v41 }
 0xf80   : > { %v2085_v43 = vpop.eup %2084 }
 0xf81   : > { %v1464_v2 = vmul.f32 %v2085_v43, %v2081_v35  ;;  %v1843_v35 = vld [vmem:[%s2594_s7] ss:$0 sm:$0xff] }
 0xf83   : > { %v1465_v44 = vpack.c.bf16 %v1464_v2, %v1463_v10 }
 0xf85   : > { %1981 = vmatmul.mubr.msk.bf16.vlgmr.msra.gmra.mxu0 %vm704_vm0, %v1465_v44 }
 0xf86   : > { %1988 = vmatprep.mubr.msk.bf16.mxu0 %vm2115_vm1, %v2114_v1  ;;  %1985 = vmatpush3.bf16.msra.mxu0 %v2052_v5  ;;  %vm1544_vm1 = vcmask 195584  }
 0xf87   : > { %1986 = vmatprep.subr.bf16.mxu0 %v2114_v1  ;;  %v1541_v1 = vsel %vm528_vm2, %v2345_v45, %v2038_v52  ;;  %v1858_v45 = vunpack.c.l.bf16 %v1857_v41  ;;  %vm1665_vm2 = vcmask 257024  }
 0xf88   : > { %v1543_v0 = vsel %vm577_vm3, %v1541_v1, %v2043_v57 }
 0xf8a   : > { %1987 = vmatpush3.bf16.msra.mxu0 %v2053_v9 }
0x1045   : > { %v1509_v12 = vpop.f32.mrf.mxu0 }
0x1047   : > { %v1982_v47 = vpop.f32.mrf.mxu0 }
0x1049   : > { %v1512_v48 = vpop.f32.mrf.mxu0 }
0x104a   : > { %v2044_v49 = vpack.i.bf16 %v1512_v48, %v1509_v12 }
0x104b   : > { %v1983_v50 = vpop.f32.mrf.mxu0 }
0x104c   : > { %2045 = vrot.lane.b32.xlu1 %v2044_v49, %s2131_s24 }
0x10be   : > { %v2046_v59 = vpop.permute.xlu1 %2045 }
0x10bf   : > { %v2048_v61 = vunpack.i.h.bf16 %v2046_v59  ;;  %v2047_v62 = vunpack.i.l.bf16 %v2046_v59 }
0x10c1   : > { %v1546_v20 = vsel %vm1544_vm1, %v1543_v0, %v2048_v61  ;;  %v1545_v6 = vsel %vm1544_vm1, %v1542_v63, %v2047_v62 }
0x10c2   : > { %v1547_v8 = vpack.c.bf16 %v1546_v20, %v1545_v6 }
0x10c4   : > { %1989 = vmatmul.mubr.msk.bf16.vlgmr.msra.gmra.mxu0 %vm704_vm0, %v1547_v8 }
0x1184   : > { %v1605_v11 = vpop.f32.mrf.mxu0 }
0x1185   : > { %v1606_v27 = vadd.f32 %v1858_v45, %v1605_v11 }
0x1186   : > { %v1990_v14 = vpop.f32.mrf.mxu0 }
0x1187   : > { %v1612_v15 = vsel %vm704_vm0, %v1606_v27, 0.0 }
0x1188   : > { %1613 = vadd.xlane.f32.xlu0 %v1612_v15  ;;  %v1608_v32 = vpop.f32.mrf.mxu0 }
0x1189   : > { %v1609_v16 = vadd.f32 %v1859_v13, %v1608_v32 }
0x118a   : > { %v1991_v17 = vpop.f32.mrf.mxu0 }
0x118b   : > { %v1615_v3 = vsel %vm704_vm0, %v1609_v16, 0.0 }
0x118c   : > { %1616 = vadd.xlane.f32.xlu1 %v1615_v3 }
0x1211   : > { %v1614_v38 = vpop.xlane.xlu0 %1613 }
0x1212   : > { %v1619_v18 = vmul.f32 0.03125, %v1614_v38 }
0x1214   : > { %v1621_v19 = vsub.f32 %v1606_v27, %v1619_v18 }
0x1215   : > { %v1617_v21 = vpop.xlane.xlu1 %1616 }
0x1216   : > { %v1620_v22 = vmul.f32 0.03125, %v1617_v21  ;;  %v1623_v46 = vmul.f32 %v1621_v19, %v1621_v19 }
0x1218   : > { %v1622_v23 = vsub.f32 %v1609_v16, %v1620_v22  ;;  %v1625_v24 = vsel %vm704_vm0, %v1623_v46, 0.0 }
0x1219   : > { %1626 = vadd.xlane.f32.xlu0 %v1625_v24 }
0x121a   : > { %v1624_v25 = vmul.f32 %v1622_v23, %v1622_v23 }
0x121c   : > { %v1628_v26 = vsel %vm704_vm0, %v1624_v25, 0.0 }
0x121d   : > { %1629 = vadd.xlane.f32.xlu0 %v1628_v26 }
0x12a2   : > { %v1627_v28 = vpop.xlane.xlu0 %1626 }
0x12a3   : > { %v1631_v56 = vmul.f32 0.03125, %v1627_v28 }
0x12a5   : > { %v1633_v29 = vadd.f32 1e-05, %v1631_v56 }
0x12a6   : > { %v1630_v30 = vpop.xlane.xlu0 %1629 }
0x12a7   : > { %2086 = vrsqrt.f32 %v1633_v29  ;;  %v1632_v60 = vmul.f32 0.03125, %v1630_v30 }
0x12a9   : > { %v1634_v31 = vadd.f32 1e-05, %v1632_v60 }
0x12ab   : > { %2088 = vrsqrt.f32 %v1634_v31 }
0x12b4   : > { %v2087_v7 = vpop.eup %2086 }
0x12b5   : > { %v1637_v34 = vmul.f32 %v2087_v7, %v1621_v19 }
0x12b7   : > { %v1646_v37 = vmul.f32 %v1842_v33, %v1637_v34 }
0x12b8   : > { %v2089_v4 = vpop.eup %2088 }
0x12b9   : > { %v1655_v39 = vadd.f32 %v1843_v35, %v1646_v37  ;;  %v1638_v36 = vmul.f32 %v2089_v4, %v1622_v23 }
0x12bb   : > { %v1854_v40 = vpack.c.bf16 %v1655_v39, %v1655_v39  ;;  %v1647_v42 = vmul.f32 %v1842_v33, %v1638_v36 }
0x12bd   : > { %1666 = vst.msk [vmem:[%s458_s16] sm:$0xf] %vm1665_vm2, %v1854_v40  ;;  %v1656_v43 = vadd.f32 %v1843_v35, %v1647_v42 }
0x12bf   : > { %v1855_v10 = vpack.c.bf16 %v1656_v43, %v1656_v43 }
0x12c1   : > { %1667 = vst.msk [vmem:[%s458_s16 + $0x4] sm:$0xf] %vm1665_vm2, %v1855_v10 }
0x12c2 PF: > { %s18_s29 = sadd.s32 1, %s2112_s29   ;;  %s2633_s27 = smov %s2108_s28 }
0x12c3   : > { %p15_p5 = scmp.ge.s32.totalorder %s18_s29, 4   ;;  %s2634_s28 = smov %s2636_s30 }
0x12c5   :  { %17 = sbr.rel (!%p15_p5) target bundleno = 2 (0x2), region = 91 }

// kernel: transformer_seq_layer_forward.9
= control target key start
LH: loop header
LB: loop body
LE: loop exit
PB: predicated region body
PF: predicated region fallthrough
CT: control target
= control target key end

     0   :  { %vm29_vm0 = vcmask 261120   ;;  %vm84_vm1 = vcmask 523264   ;;  %v352_v3 = vmov 0.0   ;;  %s449_s0 = inlined_call_operand.vmem [shape: bf16[32,64], index: 0, kind: input, shape index: {}]   ;;  %s450_s1 = inlined_call_operand.vmem [shape: bf16[64,32], index: 1, kind: input, shape index: {}]   ;;  %s451_s2 = inlined_call_operand.vmem [shape: f32[1,32], index: 2, kind: input, shape index: {}]   ;;  %s452_s3 = inlined_call_operand.vmem [shape: bf16[32,32], index: 3, kind: input, shape index: {}]   ;;  %s453_s4 = inlined_call_operand.vmem [shape: f32[1,32], index: 4, kind: input, shape index: {}]   ;;  %s454_s5 = inlined_call_operand.vmem [shape: f32[1,32], index: 5, kind: input, shape index: {}]   ;;  %s455_s6 = inlined_call_operand.hbm [shape: f32[32,32], index: 6, kind: output, shape index: {}]  }
   0x1   :  { %v316_v0 = vld [vmem:[%s450_s1 + $0x18] sm:$0xff]   ;;  %v317_v1 = vld [vmem:[%s450_s1 + $0x10] sm:$0xff]   ;;  %v318_v2 = vld [vmem:[%s450_s1 + $0x8] sm:$0xff]   ;;  %32 = vst.msk [vmem:[#allocation2 + $0x10] sm:$0xff] %vm29_vm0, %v352_v3 }
   0x2   :  { %300 = vmatprep.subr.bf16.mxu0 %v316_v0  ;;  %30 = vst.msk [vmem:[#allocation2] sm:$0xff] %vm29_vm0, %v352_v3  ;;  %31 = vst.msk [vmem:[#allocation2 + $0x8] sm:$0xff] %vm29_vm0, %v352_v3  ;;  %v320_v4 = vld [vmem:[%s449_s0] sm:$0xff]  }
   0x3   :  { %301 = vmatpush3.bf16.msra.mxu0 %v316_v0  ;;  %33 = vst.msk [vmem:[#allocation2 + $0x18] sm:$0xff] %vm29_vm0, %v352_v3  ;;  %308 = vmatprep.mubr.msk.bf16.mxu0 %vm84_vm1, %v320_v4 }
   0x4   :  { %302 = vmatprep.subr.bf16.mxu0 %v317_v1 }
   0x5   :  { %11 = vsyncpa [#allocation4], 0  ;;  %v319_v5 = vld [vmem:[%s450_s1] sm:$0xff]   ;;  %v321_v6 = vld [vmem:[%s449_s0 + $0x8] sm:$0xff]  }
   0x6   :  { %v293_v18 = vld [vmem:[%s452_s3 + $0x8] sm:$0xff]   ;;  %v282_v20 = vld [vmem:[%s451_s2] ss:$0 sm:$0xff] }
   0x7   :  { %303 = vmatpush3.bf16.msra.mxu0 %v317_v1  ;;  %v286_v21 = vld [vmem:[%s452_s3] sm:$0xff]   ;;  %v291_v22 = vunpack.c.l.bf16 %v293_v18  ;;  %v292_v29 = vunpack.c.h.bf16 %v293_v18 }
   0x8   :  { %304 = vmatprep.subr.bf16.mxu0 %v318_v2  ;;  %v36_v7 = vld [vmem:[#allocation2 + $0x10] sm:$0xff]  ;;  %v287_v25 = vunpack.c.l.bf16 %v286_v21  ;;  %v288_v34 = vunpack.c.h.bf16 %v286_v21 }
   0x9   :  { %v34_v9 = vld [vmem:[#allocation2] sm:$0xff]  ;;  %v35_v15 = vld [vmem:[#allocation2 + $0x8] sm:$0xff] }
   0xa   :  { %v37_v12 = vld [vmem:[#allocation2 + $0x18] sm:$0xff] }
   0xb   :  { %305 = vmatpush3.bf16.msra.mxu0 %v318_v2 }
   0xc   :  { %306 = vmatprep.subr.bf16.mxu0 %v319_v5 }
   0xf   :  { %307 = vmatpush3.bf16.msra.mxu0 %v319_v5 }
  0x12   :  { %309 = vmatmul.mubr.msk.bf16.vlgmr.msra.gmra.mxu0 %vm84_vm1, %v321_v6 }
  0xd2   :  { %v310_v8 = vpop.f32.mrf.mxu0 }
  0xd3   :  { %v142_v10 = vadd.f32 %v310_v8, %v36_v7 }
  0xd4   :  { %v125_v11 = vpop.f32.mrf.mxu0 }
  0xd5   :  { %147 = vst.msk [vmem:[#allocation2 + $0x10] sm:$0xff] %vm29_vm0, %v142_v10  ;;  %v140_v13 = vadd.f32 %v125_v11, %v34_v9  ;;  %v283_v11 = vld [vmem:[%s453_s4] ss:$0 sm:$0xff]  ;;  %s353_s4 = smov [#allocation3]  }
  0xd6   :  { %v311_v14 = vpop.f32.mrf.mxu0  ;;  %s263_s15 = sshll.u32 %s353_s4, 4  ;;  %s264_s15 = int_to_ptr.vmem [resolvable:$true] %s263_s15 }
  0xd7   :  { %145 = vst.msk [vmem:[#allocation2] sm:$0xff] %vm29_vm0, %v140_v13  ;;  %v143_v16 = vadd.f32 %v311_v14, %v37_v12  ;;  %v284_v13 = vld [vmem:[%s454_s5] ss:$0 sm:$0xff]  ;;  %s330_s5 = scalar_lea.vmem %s264_s15, 512  ;;  %p335_p1 = scmp.lt.s32.totalorder %s264_s15, %s264_s15 }
  0xd8   :  { %v128_v17 = vpop.f32.mrf.mxu0  ;;  %p331_p0 = scmp.ne.s32.totalorder %s264_s15, %s330_s5  ;;  %p336_p2 = scmp.lt.s32.totalorder %s330_s5, %s330_s5 }
  0xd9   :  { %148 = vst.msk [vmem:[#allocation2 + $0x18] sm:$0xff] %vm29_vm0, %v143_v16  ;;  %v141_v19 = vadd.f32 %v128_v17, %v35_v15 }
  0xda   :  { %p337_p3 = por %p336_p2, %p335_p1 }
  0xdb   :  { %146 = vst.msk [vmem:[#allocation2 + $0x8] sm:$0xff] %vm29_vm0, %v141_v19 }
  0xdc   :  { %v154_v23 = vld [vmem:[#allocation2 + $0x10] sm:$0xff]  ;;  %p338_p4 = pnand %p337_p3, %p331_p0 }
  0xdd   :  { %v165_v24 = vadd.f32 %v282_v20, %v154_v23 }
  0xde   :  { %v152_v26 = vld [vmem:[#allocation2] sm:$0xff] }
  0xdf   :  { %v177_v27 = vadd.f32 %v291_v22, %v165_v24  ;;  %v163_v28 = vadd.f32 %v282_v20, %v152_v26 }
  0xe0   :  { %v155_v30 = vld [vmem:[#allocation2 + $0x18] sm:$0xff] }
  0xe1   :  { %v185_v31 = vsel %vm29_vm0, %v177_v27, 0.0  ;;  %v175_v32 = vadd.f32 %v287_v25, %v163_v28  ;;  %v166_v33 = vadd.f32 %v282_v20, %v155_v30 }
  0xe2   :  { %186 = vadd.xlane.f32.xlu1 %v185_v31  ;;  %v153_v35 = vld [vmem:[#allocation2 + $0x8] sm:$0xff] }
  0xe3   :  { %v179_v36 = vsel %vm29_vm0, %v175_v32, 0.0  ;;  %v178_v37 = vadd.f32 %v292_v29, %v166_v33  ;;  %v164_v38 = vadd.f32 %v282_v20, %v153_v35 }
  0xe4   :  { %180 = vadd.xlane.f32.xlu0 %v179_v36 }
  0xe5   :  { %v188_v39 = vsel %vm29_vm0, %v178_v37, 0.0  ;;  %v176_v40 = vadd.f32 %v288_v34, %v164_v38 }
  0xe6   :  { %189 = vadd.xlane.f32.xlu1 %v188_v39 }
  0xe7   :  { %v182_v41 = vsel %vm29_vm0, %v176_v40, 0.0 }
  0xe8   :  { %183 = vadd.xlane.f32.xlu0 %v182_v41 }
 0x16b   :  { %v187_v42 = vpop.xlane.xlu1 %186 }
 0x16c   :  { %v194_v43 = vmul.f32 0.03125, %v187_v42 }
 0x16d   :  { %v181_v44 = vpop.xlane.xlu0 %180 }
 0x16e   :  { %v192_v45 = vmul.f32 0.03125, %v181_v44  ;;  %v198_v47 = vsub.f32 %v177_v27, %v194_v43 }
 0x16f   :  { %v190_v46 = vpop.xlane.xlu1 %189 }
 0x170   :  { %v196_v48 = vsub.f32 %v175_v32, %v192_v45  ;;  %v195_v49 = vmul.f32 0.03125, %v190_v46  ;;  %v202_v56 = vmul.f32 %v198_v47, %v198_v47 }
 0x171   :  { %v184_v50 = vpop.xlane.xlu0 %183 }
 0x172   :  { %v193_v51 = vmul.f32 0.03125, %v184_v50  ;;  %v200_v52 = vmul.f32 %v196_v48, %v196_v48  ;;  %v199_v53 = vsub.f32 %v178_v37, %v195_v49  ;;  %v210_v58 = vsel %vm29_vm0, %v202_v56, 0.0 }
 0x174   :  { %v197_v54 = vsub.f32 %v176_v40, %v193_v51  ;;  %v204_v55 = vsel %vm29_vm0, %v200_v52, 0.0  ;;  %v203_v60 = vmul.f32 %v199_v53, %v199_v53 }
 0x175   :  { %205 = vadd.xlane.f32.xlu0 %v204_v55 }
 0x176   :  { %v201_v57 = vmul.f32 %v197_v54, %v197_v54  ;;  %v213_v61 = vsel %vm29_vm0, %v203_v60, 0.0 }
 0x178   :  { %v207_v59 = vsel %vm29_vm0, %v201_v57, 0.0 }
 0x179   :  { %211 = vadd.xlane.f32.xlu0 %v210_v58  ;;  %208 = vadd.xlane.f32.xlu1 %v207_v59 }
 0x17d   :  { %214 = vadd.xlane.f32.xlu1 %v213_v61 }
 0x1fe   :  { %v206_v62 = vpop.xlane.xlu0 %205 }
 0x1ff   :  { %v216_v63 = vmul.f32 0.03125, %v206_v62 }
 0x201   :  { %v220_v0 = vadd.f32 1e-05, %v216_v63 }
 0x202   :  { %v209_v1 = vpop.xlane.xlu1 %208  ;;  %v212_v2 = vpop.xlane.xlu0 %211 }
 0x203   :  { %322 = vrsqrt.f32 %v220_v0  ;;  %v217_v3 = vmul.f32 0.03125, %v209_v1  ;;  %v218_v4 = vmul.f32 0.03125, %v212_v2 }
 0x205   :  { %v221_v5 = vadd.f32 1e-05, %v217_v3  ;;  %v222_v6 = vadd.f32 1e-05, %v218_v4 }
 0x206   :  { %v215_v7 = vpop.xlane.xlu1 %214 }
 0x207   :  { %324 = vrsqrt.f32 %v221_v5  ;;  %v219_v8 = vmul.f32 0.03125, %v215_v7 }
 0x208   :  { %326 = vrsqrt.f32 %v222_v6 }
 0x209   :  { %v223_v9 = vadd.f32 1e-05, %v219_v8 }
 0x20b   :  { %328 = vrsqrt.f32 %v223_v9 }
 0x210   :  { %v323_v10 = vpop.eup %322 }
 0x211   :  { %v228_v12 = vmul.f32 %v323_v10, %v196_v48 }
 0x213   :  { %v239_v14 = vmul.f32 %v283_v11, %v228_v12 }
 0x214   :  { %v325_v15 = vpop.eup %324 }
 0x215   :  { %v327_v16 = vpop.eup %326  ;;  %v229_v17 = vmul.f32 %v325_v15, %v197_v54  ;;  %v250_v18 = vadd.f32 %v284_v13, %v239_v14 }
 0x216   :  { %v230_v19 = vmul.f32 %v327_v16, %v198_v47 }
 0x217   :  { %v240_v20 = vmul.f32 %v283_v11, %v229_v17  ;;  %254 = vst.msk [vmem:[#allocation3] sm:$0xff] %vm29_vm0, %v250_v18 }
 0x218   :  { %v329_v21 = vpop.eup %328  ;;  %v241_v22 = vmul.f32 %v283_v11, %v230_v19 }
 0x219   :  { %v231_v23 = vmul.f32 %v329_v21, %v199_v53  ;;  %v251_v24 = vadd.f32 %v284_v13, %v240_v20 }
 0x21a   :  { %v252_v25 = vadd.f32 %v284_v13, %v241_v22 }
 0x21b   :  { %v242_v26 = vmul.f32 %v283_v11, %v231_v23  ;;  %255 = vst.msk [vmem:[#allocation3 + $0x8] sm:$0xff] %vm29_vm0, %v251_v24 }
 0x21c   :  { %256 = vst.msk [vmem:[#allocation3 + $0x10] sm:$0xff] %vm29_vm0, %v252_v25 }
 0x21d   :  { %v253_v27 = vadd.f32 %v284_v13, %v242_v26 }
 0x21f   :  { %257 = vst.msk [vmem:[#allocation3 + $0x18] sm:$0xff] %vm29_vm0, %v253_v27 }
 0x220   :  { %341 = shalt.err (!%p338_p4)
}
 0x221   :  { %s354_s16 = smov 128   ;;  %s355_s17 = smov 8  }
 0x222   :  { %269 = dma.vmem_to_hbm [thread:$0]  %s264_s15, 512, %s455_s6, [#allocation4], %s354_s16, %s354_s16, %s355_s17  }
 0x223   :  { %350 = dma.done.wait [#allocation4], 512  }
 0x224   :  { %351 = vsyncadd [#allocation4], 4294966784 }
 0x225   :  { %273 = vsyncpa [#allocation4], 1 }

</bundles_post_ra>
